<compile_context>
chip_gen: v5e
topology: v5e:2x2
jax: 0.10.0
libtpu: 0.0.40
codegen_flags: <defaults>
</compile_context>

<pallas_src>
import math
import jax
import jax.numpy as jnp
from jax import lax
from jax.experimental import pallas as pl
from jax.experimental.pallas import tpu as pltpu


def _round_up(x, m):
    return ((x + m - 1) // m) * m


def traffic_encoder_kernel(idx_ref, proj_ref, whh_ref, out_ref, gx_ref):
    """
    idx_ref : (S, Bt, V_pad) int32  traffic state, pre-broadcast along lanes
    proj_ref: (V_pad, 4*H)   f32    emb @ W_ih^T + (b_ih + b_hh), gate order (i,f,o,g)
    whh_ref : (H, 4*H)       bf16   W_hh^T, gate order (i,f,o,g)
    out_ref : (1, Bt, H)     f32    final hidden state for this batch tile
    gx_ref  : (S*Bt, 4*H)    f32    scratch: input-side gate pre-activations
    """
    s, bt, v_pad = idx_ref.shape
    hd = whh_ref.shape[0]

    # ---- hoisted input path: ONE one-hot matmul for all timesteps -----------
    # (leading-dim collapse only; lane dim stays a full 128 multiple)
    idx2 = idx_ref[...].reshape(s * bt, v_pad)
    col = lax.broadcasted_iota(jnp.int32, (s * bt, v_pad), 1)
    onehot = (idx2 == col).astype(jnp.float32)            # exact 0/1 selection
    gx_ref[...] = jnp.dot(onehot, proj_ref[...],
                          preferred_element_type=jnp.float32)

    h0 = jnp.zeros((bt, hd), jnp.float32)
    c0 = jnp.zeros((bt, hd), jnp.float32)

    def step(t, carry):
        h, c = carry
        off = pl.multiple_of(t * bt, 8)
        # serial chain: one small bf16 matmul + gate elementwise math
        gates = gx_ref[pl.ds(off, bt), :] + jnp.dot(
            h.astype(jnp.bfloat16), whh_ref[...],
            preferred_element_type=jnp.float32)            # (Bt, 4*H)
        sig = jax.nn.sigmoid(gates)                        # 2 full vreg EUP pushes
        i_g = sig[:, 0 * hd:1 * hd]
        f_g = sig[:, 1 * hd:2 * hd]
        o_g = sig[:, 2 * hd:3 * hd]
        g_g = jnp.tanh(gates[:, 3 * hd:])
        c_new = f_g * c + i_g * g_g
        h_new = o_g * jnp.tanh(c_new)
        return h_new, c_new

    h_final, _ = lax.fori_loop(0, s, step, (h0, c0), unroll=8)
    out_ref[...] = h_final[None]


def traffic_encoder(traffic_state, emb_table, w_ih, w_hh, b_ih, b_hh,
                    *, num_layers=1):
    """traffic_state: (seq_len, batch) int. Returns (num_layers, batch, h_dim)."""
    assert num_layers == 1, "kernel implements the single-layer LSTM of the module"
    seq_len, batch = traffic_state.shape
    v, e = emb_table.shape
    h_dim = w_hh.shape[1]

    v_pad = _round_up(max(v, 8), 128)
    b_pad = _round_up(batch, 8)

    # batch tiling: split across TensorCores (v7x megacore) when batch is large
    n_btiles, bt = 1, b_pad
    if b_pad >= 256 and (b_pad // 2) % 8 == 0:
        n_btiles, bt = 2, b_pad // 2

    emb_table = jnp.asarray(emb_table, jnp.float32)
    w_ih = jnp.asarray(w_ih, jnp.float32)
    w_hh = jnp.asarray(w_hh, jnp.float32)
    bias = jnp.asarray(b_ih, jnp.float32) + jnp.asarray(b_hh, jnp.float32)

    def reorder_gates(m):  # torch gate order (i,f,g,o) -> kernel order (i,f,o,g)
        rows = m.shape[0]
        return m.reshape(rows, 4, h_dim)[:, (0, 1, 3, 2), :].reshape(rows, 4 * h_dim)

    # fused embedding + input projection + combined bias (hoisted out of recurrence)
    emb_pad = jnp.zeros((v_pad, e), jnp.float32).at[:v].set(emb_table)
    proj_p = reorder_gates(emb_pad @ w_ih.T + bias[None, :])          # (V_pad, 4H) f32
    whh_p = reorder_gates(w_hh.T).astype(jnp.bfloat16)                # (H, 4H) bf16

    # indices: pad batch to sublane multiple, pre-broadcast along the lane axis.
    # NOTE: out-of-range indices produce an all-zero one-hot row (bias-only gates)
    # instead of erroring like torch.nn.Embedding.
    idx = jnp.zeros((seq_len, b_pad), jnp.int32).at[:, :batch].set(
        traffic_state.astype(jnp.int32))
    idx_b = jnp.broadcast_to(idx[:, :, None], (seq_len, b_pad, v_pad))

    out = pl.pallas_call(
        traffic_encoder_kernel,
        out_shape=jax.ShapeDtypeStruct((num_layers, b_pad, h_dim), jnp.float32),
        grid=(n_btiles,),
        in_specs=[
            pl.BlockSpec((seq_len, bt, v_pad), lambda i: (0, i, 0)),
            pl.BlockSpec((v_pad, 4 * h_dim), lambda i: (0, 0)),
            pl.BlockSpec((h_dim, 4 * h_dim), lambda i: (0, 0)),
        ],
        out_specs=pl.BlockSpec((num_layers, bt, h_dim), lambda i: (0, i, 0)),
        scratch_shapes=[pltpu.VMEM((seq_len * bt, 4 * h_dim), jnp.float32)],
        compiler_params=pltpu.CompilerParams(
            dimension_semantics=("parallel",),
            vmem_limit_bytes=32 * 1024 * 1024),
    )(idx_b, proj_p, whh_p)
    return out[:, :batch, :]


def reference(traffic_state, emb_table, w_ih, w_hh, b_ih, b_hh):
    """Pure-JAX reference matching torch.nn.Embedding + torch.nn.LSTM (f32)."""
    seq_len, batch = traffic_state.shape
    h_dim = w_hh.shape[1]
    x_emb = emb_table[traffic_state]                    # (S, B, E)
    h = jnp.zeros((batch, h_dim), jnp.float32)
    c = jnp.zeros((batch, h_dim), jnp.float32)

    def step(carry, x):
        h, c = carry
        gates = x @ w_ih.T + h @ w_hh.T + b_ih + b_hh
        i, f, g, o = jnp.split(gates, 4, axis=-1)
        c = jax.nn.sigmoid(f) * c + jax.nn.sigmoid(i) * jnp.tanh(g)
        h = jax.nn.sigmoid(o) * jnp.tanh(c)
        return (h, c), None

    (h, c), _ = lax.scan(step, (h, c), x_emb)
    return h[None]


if __name__ == "__main__":
    # module hyper-parameters (PyTorch defaults), small shapes
    traffic_state_dim = 5
    embedding_dim = 64
    h_dim = 64
    num_layers = 1
    seq_len, batch = 8, 16

    key = jax.random.PRNGKey(0)
    k_emb, k_wih, k_whh, k_bih, k_bhh, k_idx = jax.random.split(key, 6)

    bound = 1.0 / math.sqrt(h_dim)
    emb_table = jax.random.normal(k_emb, (traffic_state_dim, embedding_dim),
                                  jnp.float32)
    w_ih = jax.random.uniform(k_wih, (4 * h_dim, embedding_dim),
                              jnp.float32, -bound, bound)
    w_hh = jax.random.uniform(k_whh, (4 * h_dim, h_dim),
                              jnp.float32, -bound, bound)
    b_ih = jax.random.uniform(k_bih, (4 * h_dim,), jnp.float32, -bound, bound)
    b_hh = jax.random.uniform(k_bhh, (4 * h_dim,), jnp.float32, -bound, bound)

    # traffic_state: (seq_len, batch) integer states in [0, traffic_state_dim)
    traffic_state = jax.random.randint(k_idx, (seq_len, batch), 0,
                                       traffic_state_dim, jnp.int32)

    final_h = traffic_encoder(traffic_state, emb_table, w_ih, w_hh, b_ih, b_hh,
                              num_layers=num_layers)
    final_h = jax.block_until_ready(final_h)

    ref = reference(traffic_state, emb_table, w_ih, w_hh, b_ih, b_hh)
    assert final_h.shape == (num_layers, batch, h_dim)
    # tolerance loosened from 1e-4 because the recurrent W_hh matmul runs in bf16
    assert jnp.allclose(final_h, ref, atol=2e-2, rtol=2e-2), "mismatch vs reference"
    print("KERNEL_OK")
</pallas_src>

<mosaic_0001>
module attributes {stable_mosaic.version = 11 : i64} {
  func.func @traffic_encoder_kernel(%arg0: i32, %arg1: memref<8x16x128xi32, #tpu.memory_space<vmem>>, %arg2: memref<128x256xf32, #tpu.memory_space<vmem>>, %arg3: memref<64x256xbf16, #tpu.memory_space<vmem>>, %arg4: memref<1x16x64xf32, #tpu.memory_space<vmem>>, %arg5: memref<128x256xf32, #tpu.memory_space<vmem>>) attributes {dimension_semantics = [#tpu.dimension_semantics<parallel>], iteration_bounds = array<i64: 1>, scalar_prefetch = 0 : i64, scratch_operands = 1 : i64, tpu.core_type = #tpu.core_type<tc>, window_params = [{transform_indices = @transform_0, window_bounds = array<i64: 8, 16, 128>}, {pipeline_mode = #tpu.pipeline_mode<synchronous>, transform_indices = @transform_1, window_bounds = array<i64: 128, 256>}, {pipeline_mode = #tpu.pipeline_mode<synchronous>, transform_indices = @transform_2, window_bounds = array<i64: 64, 256>}, {transform_indices = @transform_3, window_bounds = array<i64: 1, 16, 64>}]} {
    %c0 = arith.constant 0 : index
    %c0_0 = arith.constant 0 : index
    %c0_1 = arith.constant 0 : index
    %0 = vector.load %arg1[%c0, %c0_0, %c0_1] : memref<8x16x128xi32, #tpu.memory_space<vmem>>, vector<8x16x128xi32>
    %1 = vector.shape_cast %0 : vector<8x16x128xi32> to vector<128x128xi32>
    %2 = tpu.iota {dimensions = array<i32: 1>} : vector<128x128xi32>
    %3 = arith.cmpi eq, %1, %2 : vector<128x128xi32>
    %4 = arith.extui %3 : vector<128x128xi1> to vector<128x128xi32>
    %5 = arith.sitofp %4 : vector<128x128xi32> to vector<128x128xf32>
    %c0_2 = arith.constant 0 : index
    %c0_3 = arith.constant 0 : index
    %6 = vector.load %arg2[%c0_2, %c0_3] : memref<128x256xf32, #tpu.memory_space<vmem>>, vector<128x256xf32>
    %cst = arith.constant dense<0.000000e+00> : vector<128x256xf32>
    %7 = tpu.matmul %5, %6, %cst {dimension_numbers = #tpu.dot_dimension_numbers<[1], [0], [0], [1], [0, 0, 1, 1], [], []>} : vector<128x128xf32>, vector<128x256xf32>, vector<128x256xf32> -> vector<128x256xf32>
    %c0_4 = arith.constant 0 : index
    %c0_5 = arith.constant 0 : index
    %8 = vector.load %arg5[%c0_4, %c0_5] : memref<128x256xf32, #tpu.memory_space<vmem>>, vector<128x256xf32>
    tpu.vector_store %arg5[%c0_4, %c0_5], %7 {strides = array<i32>} : memref<128x256xf32, #tpu.memory_space<vmem>>, vector<128x256xf32>,
    %cst_6 = arith.constant 0.000000e+00 : f32
    %9 = vector.broadcast %cst_6 : f32 to vector<16x64xf32>
    %cst_7 = arith.constant 0.000000e+00 : f32
    %10 = vector.broadcast %cst_7 : f32 to vector<16x64xf32>
    %c0_i32 = arith.constant 0 : i32
    %c16_i32 = arith.constant 16 : i32
    %11 = arith.muli %c0_i32, %c16_i32 : i32
    %12 = tpu.assume_multiple %11, 8 : i32
    %13 = arith.index_cast %12 : i32 to index
    %c0_8 = arith.constant 0 : index
    %14 = vector.load %arg5[%13, %c0_8] : memref<128x256xf32, #tpu.memory_space<vmem>>, vector<16x256xf32>
    %15 = arith.truncf %9 : vector<16x64xf32> to vector<16x64xbf16>
    %c0_9 = arith.constant 0 : index
    %c0_10 = arith.constant 0 : index
    %16 = vector.load %arg3[%c0_9, %c0_10] : memref<64x256xbf16, #tpu.memory_space<vmem>>, vector<64x256xbf16>
    %cst_11 = arith.constant dense<0.000000e+00> : vector<16x256xf32>
    %17 = tpu.matmul %15, %16, %cst_11 {dimension_numbers = #tpu.dot_dimension_numbers<[1], [0], [0], [1], [0, 0, 1, 1], [], []>} : vector<16x64xbf16>, vector<64x256xbf16>, vector<16x256xf32> -> vector<16x256xf32>
    %18 = arith.addf %14, %17 : vector<16x256xf32>
    %19 = arith.negf %18 : vector<16x256xf32>
    %20 = math.exp %19 : vector<16x256xf32>
    %cst_12 = arith.constant 1.000000e+00 : f32
    %21 = vector.broadcast %cst_12 : f32 to vector<16x256xf32>
    %22 = arith.addf %21, %20 : vector<16x256xf32>
    %23 = arith.divf %21, %22 : vector<16x256xf32>
    %24 = vector.extract_strided_slice %23 {offsets = [0, 0], sizes = [16, 64], strides = [1, 1]} : vector<16x256xf32> to vector<16x64xf32>
    %25 = vector.extract_strided_slice %23 {offsets = [0, 64], sizes = [16, 64], strides = [1, 1]} : vector<16x256xf32> to vector<16x64xf32>
    %26 = vector.extract_strided_slice %23 {offsets = [0, 128], sizes = [16, 64], strides = [1, 1]} : vector<16x256xf32> to vector<16x64xf32>
    %27 = vector.extract_strided_slice %18 {offsets = [0, 192], sizes = [16, 64], strides = [1, 1]} : vector<16x256xf32> to vector<16x64xf32>
    %28 = math.tanh %27 : vector<16x64xf32>
    %29 = arith.mulf %25, %10 : vector<16x64xf32>
    %30 = arith.mulf %24, %28 : vector<16x64xf32>
    %31 = arith.addf %29, %30 : vector<16x64xf32>
    %32 = math.tanh %31 : vector<16x64xf32>
    %33 = arith.mulf %26, %32 : vector<16x64xf32>
    %c1_i32 = arith.constant 1 : i32
    %c16_i32_13 = arith.constant 16 : i32
    %34 = arith.muli %c1_i32, %c16_i32_13 : i32
    %35 = tpu.assume_multiple %34, 8 : i32
    %36 = arith.index_cast %35 : i32 to index
    %c0_14 = arith.constant 0 : index
    %37 = vector.load %arg5[%36, %c0_14] : memref<128x256xf32, #tpu.memory_space<vmem>>, vector<16x256xf32>
    %38 = arith.truncf %33 : vector<16x64xf32> to vector<16x64xbf16>
    %c0_15 = arith.constant 0 : index
    %c0_16 = arith.constant 0 : index
    %39 = vector.load %arg3[%c0_15, %c0_16] : memref<64x256xbf16, #tpu.memory_space<vmem>>, vector<64x256xbf16>
    %cst_17 = arith.constant dense<0.000000e+00> : vector<16x256xf32>
    %40 = tpu.matmul %38, %39, %cst_17 {dimension_numbers = #tpu.dot_dimension_numbers<[1], [0], [0], [1], [0, 0, 1, 1], [], []>} : vector<16x64xbf16>, vector<64x256xbf16>, vector<16x256xf32> -> vector<16x256xf32>
    %41 = arith.addf %37, %40 : vector<16x256xf32>
    %42 = arith.negf %41 : vector<16x256xf32>
    %43 = math.exp %42 : vector<16x256xf32>
    %cst_18 = arith.constant 1.000000e+00 : f32
    %44 = vector.broadcast %cst_18 : f32 to vector<16x256xf32>
    %45 = arith.addf %44, %43 : vector<16x256xf32>
    %46 = arith.divf %44, %45 : vector<16x256xf32>
    %47 = vector.extract_strided_slice %46 {offsets = [0, 0], sizes = [16, 64], strides = [1, 1]} : vector<16x256xf32> to vector<16x64xf32>
    %48 = vector.extract_strided_slice %46 {offsets = [0, 64], sizes = [16, 64], strides = [1, 1]} : vector<16x256xf32> to vector<16x64xf32>
    %49 = vector.extract_strided_slice %46 {offsets = [0, 128], sizes = [16, 64], strides = [1, 1]} : vector<16x256xf32> to vector<16x64xf32>
    %50 = vector.extract_strided_slice %41 {offsets = [0, 192], sizes = [16, 64], strides = [1, 1]} : vector<16x256xf32> to vector<16x64xf32>
    %51 = math.tanh %50 : vector<16x64xf32>
    %52 = arith.mulf %48, %31 : vector<16x64xf32>
    %53 = arith.mulf %47, %51 : vector<16x64xf32>
    %54 = arith.addf %52, %53 : vector<16x64xf32>
    %55 = math.tanh %54 : vector<16x64xf32>
    %56 = arith.mulf %49, %55 : vector<16x64xf32>
    %c2_i32 = arith.constant 2 : i32
    %c16_i32_19 = arith.constant 16 : i32
    %57 = arith.muli %c2_i32, %c16_i32_19 : i32
    %58 = tpu.assume_multiple %57, 8 : i32
    %59 = arith.index_cast %58 : i32 to index
    %c0_20 = arith.constant 0 : index
    %60 = vector.load %arg5[%59, %c0_20] : memref<128x256xf32, #tpu.memory_space<vmem>>, vector<16x256xf32>
    %61 = arith.truncf %56 : vector<16x64xf32> to vector<16x64xbf16>
    %c0_21 = arith.constant 0 : index
    %c0_22 = arith.constant 0 : index
    %62 = vector.load %arg3[%c0_21, %c0_22] : memref<64x256xbf16, #tpu.memory_space<vmem>>, vector<64x256xbf16>
    %cst_23 = arith.constant dense<0.000000e+00> : vector<16x256xf32>
    %63 = tpu.matmul %61, %62, %cst_23 {dimension_numbers = #tpu.dot_dimension_numbers<[1], [0], [0], [1], [0, 0, 1, 1], [], []>} : vector<16x64xbf16>, vector<64x256xbf16>, vector<16x256xf32> -> vector<16x256xf32>
    %64 = arith.addf %60, %63 : vector<16x256xf32>
    %65 = arith.negf %64 : vector<16x256xf32>
    %66 = math.exp %65 : vector<16x256xf32>
    %cst_24 = arith.constant 1.000000e+00 : f32
    %67 = vector.broadcast %cst_24 : f32 to vector<16x256xf32>
    %68 = arith.addf %67, %66 : vector<16x256xf32>
    %69 = arith.divf %67, %68 : vector<16x256xf32>
    %70 = vector.extract_strided_slice %69 {offsets = [0, 0], sizes = [16, 64], strides = [1, 1]} : vector<16x256xf32> to vector<16x64xf32>
    %71 = vector.extract_strided_slice %69 {offsets = [0, 64], sizes = [16, 64], strides = [1, 1]} : vector<16x256xf32> to vector<16x64xf32>
    %72 = vector.extract_strided_slice %69 {offsets = [0, 128], sizes = [16, 64], strides = [1, 1]} : vector<16x256xf32> to vector<16x64xf32>
    %73 = vector.extract_strided_slice %64 {offsets = [0, 192], sizes = [16, 64], strides = [1, 1]} : vector<16x256xf32> to vector<16x64xf32>
    %74 = math.tanh %73 : vector<16x64xf32>
    %75 = arith.mulf %71, %54 : vector<16x64xf32>
    %76 = arith.mulf %70, %74 : vector<16x64xf32>
    %77 = arith.addf %75, %76 : vector<16x64xf32>
    %78 = math.tanh %77 : vector<16x64xf32>
    %79 = arith.mulf %72, %78 : vector<16x64xf32>
    %c3_i32 = arith.constant 3 : i32
    %c16_i32_25 = arith.constant 16 : i32
    %80 = arith.muli %c3_i32, %c16_i32_25 : i32
    %81 = tpu.assume_multiple %80, 8 : i32
    %82 = arith.index_cast %81 : i32 to index
    %c0_26 = arith.constant 0 : index
    %83 = vector.load %arg5[%82, %c0_26] : memref<128x256xf32, #tpu.memory_space<vmem>>, vector<16x256xf32>
    %84 = arith.truncf %79 : vector<16x64xf32> to vector<16x64xbf16>
    %c0_27 = arith.constant 0 : index
    %c0_28 = arith.constant 0 : index
    %85 = vector.load %arg3[%c0_27, %c0_28] : memref<64x256xbf16, #tpu.memory_space<vmem>>, vector<64x256xbf16>
    %cst_29 = arith.constant dense<0.000000e+00> : vector<16x256xf32>
    %86 = tpu.matmul %84, %85, %cst_29 {dimension_numbers = #tpu.dot_dimension_numbers<[1], [0], [0], [1], [0, 0, 1, 1], [], []>} : vector<16x64xbf16>, vector<64x256xbf16>, vector<16x256xf32> -> vector<16x256xf32>
    %87 = arith.addf %83, %86 : vector<16x256xf32>
    %88 = arith.negf %87 : vector<16x256xf32>
    %89 = math.exp %88 : vector<16x256xf32>
    %cst_30 = arith.constant 1.000000e+00 : f32
    %90 = vector.broadcast %cst_30 : f32 to vector<16x256xf32>
    %91 = arith.addf %90, %89 : vector<16x256xf32>
    %92 = arith.divf %90, %91 : vector<16x256xf32>
    %93 = vector.extract_strided_slice %92 {offsets = [0, 0], sizes = [16, 64], strides = [1, 1]} : vector<16x256xf32> to vector<16x64xf32>
    %94 = vector.extract_strided_slice %92 {offsets = [0, 64], sizes = [16, 64], strides = [1, 1]} : vector<16x256xf32> to vector<16x64xf32>
    %95 = vector.extract_strided_slice %92 {offsets = [0, 128], sizes = [16, 64], strides = [1, 1]} : vector<16x256xf32> to vector<16x64xf32>
    %96 = vector.extract_strided_slice %87 {offsets = [0, 192], sizes = [16, 64], strides = [1, 1]} : vector<16x256xf32> to vector<16x64xf32>
    %97 = math.tanh %96 : vector<16x64xf32>
    %98 = arith.mulf %94, %77 : vector<16x64xf32>
    %99 = arith.mulf %93, %97 : vector<16x64xf32>
    %100 = arith.addf %98, %99 : vector<16x64xf32>
    %101 = math.tanh %100 : vector<16x64xf32>
    %102 = arith.mulf %95, %101 : vector<16x64xf32>
    %c4_i32 = arith.constant 4 : i32
    %c16_i32_31 = arith.constant 16 : i32
    %103 = arith.muli %c4_i32, %c16_i32_31 : i32
    %104 = tpu.assume_multiple %103, 8 : i32
    %105 = arith.index_cast %104 : i32 to index
    %c0_32 = arith.constant 0 : index
    %106 = vector.load %arg5[%105, %c0_32] : memref<128x256xf32, #tpu.memory_space<vmem>>, vector<16x256xf32>
    %107 = arith.truncf %102 : vector<16x64xf32> to vector<16x64xbf16>
    %c0_33 = arith.constant 0 : index
    %c0_34 = arith.constant 0 : index
    %108 = vector.load %arg3[%c0_33, %c0_34] : memref<64x256xbf16, #tpu.memory_space<vmem>>, vector<64x256xbf16>
    %cst_35 = arith.constant dense<0.000000e+00> : vector<16x256xf32>
    %109 = tpu.matmul %107, %108, %cst_35 {dimension_numbers = #tpu.dot_dimension_numbers<[1], [0], [0], [1], [0, 0, 1, 1], [], []>} : vector<16x64xbf16>, vector<64x256xbf16>, vector<16x256xf32> -> vector<16x256xf32>
    %110 = arith.addf %106, %109 : vector<16x256xf32>
    %111 = arith.negf %110 : vector<16x256xf32>
    %112 = math.exp %111 : vector<16x256xf32>
    %cst_36 = arith.constant 1.000000e+00 : f32
    %113 = vector.broadcast %cst_36 : f32 to vector<16x256xf32>
    %114 = arith.addf %113, %112 : vector<16x256xf32>
    %115 = arith.divf %113, %114 : vector<16x256xf32>
    %116 = vector.extract_strided_slice %115 {offsets = [0, 0], sizes = [16, 64], strides = [1, 1]} : vector<16x256xf32> to vector<16x64xf32>
    %117 = vector.extract_strided_slice %115 {offsets = [0, 64], sizes = [16, 64], strides = [1, 1]} : vector<16x256xf32> to vector<16x64xf32>
    %118 = vector.extract_strided_slice %115 {offsets = [0, 128], sizes = [16, 64], strides = [1, 1]} : vector<16x256xf32> to vector<16x64xf32>
    %119 = vector.extract_strided_slice %110 {offsets = [0, 192], sizes = [16, 64], strides = [1, 1]} : vector<16x256xf32> to vector<16x64xf32>
    %120 = math.tanh %119 : vector<16x64xf32>
    %121 = arith.mulf %117, %100 : vector<16x64xf32>
    %122 = arith.mulf %116, %120 : vector<16x64xf32>
    %123 = arith.addf %121, %122 : vector<16x64xf32>
    %124 = math.tanh %123 : vector<16x64xf32>
    %125 = arith.mulf %118, %124 : vector<16x64xf32>
    %c5_i32 = arith.constant 5 : i32
    %c16_i32_37 = arith.constant 16 : i32
    %126 = arith.muli %c5_i32, %c16_i32_37 : i32
    %127 = tpu.assume_multiple %126, 8 : i32
    %128 = arith.index_cast %127 : i32 to index
    %c0_38 = arith.constant 0 : index
    %129 = vector.load %arg5[%128, %c0_38] : memref<128x256xf32, #tpu.memory_space<vmem>>, vector<16x256xf32>
    %130 = arith.truncf %125 : vector<16x64xf32> to vector<16x64xbf16>
    %c0_39 = arith.constant 0 : index
    %c0_40 = arith.constant 0 : index
    %131 = vector.load %arg3[%c0_39, %c0_40] : memref<64x256xbf16, #tpu.memory_space<vmem>>, vector<64x256xbf16>
    %cst_41 = arith.constant dense<0.000000e+00> : vector<16x256xf32>
    %132 = tpu.matmul %130, %131, %cst_41 {dimension_numbers = #tpu.dot_dimension_numbers<[1], [0], [0], [1], [0, 0, 1, 1], [], []>} : vector<16x64xbf16>, vector<64x256xbf16>, vector<16x256xf32> -> vector<16x256xf32>
    %133 = arith.addf %129, %132 : vector<16x256xf32>
    %134 = arith.negf %133 : vector<16x256xf32>
    %135 = math.exp %134 : vector<16x256xf32>
    %cst_42 = arith.constant 1.000000e+00 : f32
    %136 = vector.broadcast %cst_42 : f32 to vector<16x256xf32>
    %137 = arith.addf %136, %135 : vector<16x256xf32>
    %138 = arith.divf %136, %137 : vector<16x256xf32>
    %139 = vector.extract_strided_slice %138 {offsets = [0, 0], sizes = [16, 64], strides = [1, 1]} : vector<16x256xf32> to vector<16x64xf32>
    %140 = vector.extract_strided_slice %138 {offsets = [0, 64], sizes = [16, 64], strides = [1, 1]} : vector<16x256xf32> to vector<16x64xf32>
    %141 = vector.extract_strided_slice %138 {offsets = [0, 128], sizes = [16, 64], strides = [1, 1]} : vector<16x256xf32> to vector<16x64xf32>
    %142 = vector.extract_strided_slice %133 {offsets = [0, 192], sizes = [16, 64], strides = [1, 1]} : vector<16x256xf32> to vector<16x64xf32>
    %143 = math.tanh %142 : vector<16x64xf32>
    %144 = arith.mulf %140, %123 : vector<16x64xf32>
    %145 = arith.mulf %139, %143 : vector<16x64xf32>
    %146 = arith.addf %144, %145 : vector<16x64xf32>
    %147 = math.tanh %146 : vector<16x64xf32>
    %148 = arith.mulf %141, %147 : vector<16x64xf32>
    %c6_i32 = arith.constant 6 : i32
    %c16_i32_43 = arith.constant 16 : i32
    %149 = arith.muli %c6_i32, %c16_i32_43 : i32
    %150 = tpu.assume_multiple %149, 8 : i32
    %151 = arith.index_cast %150 : i32 to index
    %c0_44 = arith.constant 0 : index
    %152 = vector.load %arg5[%151, %c0_44] : memref<128x256xf32, #tpu.memory_space<vmem>>, vector<16x256xf32>
    %153 = arith.truncf %148 : vector<16x64xf32> to vector<16x64xbf16>
    %c0_45 = arith.constant 0 : index
    %c0_46 = arith.constant 0 : index
    %154 = vector.load %arg3[%c0_45, %c0_46] : memref<64x256xbf16, #tpu.memory_space<vmem>>, vector<64x256xbf16>
    %cst_47 = arith.constant dense<0.000000e+00> : vector<16x256xf32>
    %155 = tpu.matmul %153, %154, %cst_47 {dimension_numbers = #tpu.dot_dimension_numbers<[1], [0], [0], [1], [0, 0, 1, 1], [], []>} : vector<16x64xbf16>, vector<64x256xbf16>, vector<16x256xf32> -> vector<16x256xf32>
    %156 = arith.addf %152, %155 : vector<16x256xf32>
    %157 = arith.negf %156 : vector<16x256xf32>
    %158 = math.exp %157 : vector<16x256xf32>
    %cst_48 = arith.constant 1.000000e+00 : f32
    %159 = vector.broadcast %cst_48 : f32 to vector<16x256xf32>
    %160 = arith.addf %159, %158 : vector<16x256xf32>
    %161 = arith.divf %159, %160 : vector<16x256xf32>
    %162 = vector.extract_strided_slice %161 {offsets = [0, 0], sizes = [16, 64], strides = [1, 1]} : vector<16x256xf32> to vector<16x64xf32>
    %163 = vector.extract_strided_slice %161 {offsets = [0, 64], sizes = [16, 64], strides = [1, 1]} : vector<16x256xf32> to vector<16x64xf32>
    %164 = vector.extract_strided_slice %161 {offsets = [0, 128], sizes = [16, 64], strides = [1, 1]} : vector<16x256xf32> to vector<16x64xf32>
    %165 = vector.extract_strided_slice %156 {offsets = [0, 192], sizes = [16, 64], strides = [1, 1]} : vector<16x256xf32> to vector<16x64xf32>
    %166 = math.tanh %165 : vector<16x64xf32>
    %167 = arith.mulf %163, %146 : vector<16x64xf32>
    %168 = arith.mulf %162, %166 : vector<16x64xf32>
    %169 = arith.addf %167, %168 : vector<16x64xf32>
    %170 = math.tanh %169 : vector<16x64xf32>
    %171 = arith.mulf %164, %170 : vector<16x64xf32>
    %c7_i32 = arith.constant 7 : i32
    %c16_i32_49 = arith.constant 16 : i32
    %172 = arith.muli %c7_i32, %c16_i32_49 : i32
    %173 = tpu.assume_multiple %172, 8 : i32
    %174 = arith.index_cast %173 : i32 to index
    %c0_50 = arith.constant 0 : index
    %175 = vector.load %arg5[%174, %c0_50] : memref<128x256xf32, #tpu.memory_space<vmem>>, vector<16x256xf32>
    %176 = arith.truncf %171 : vector<16x64xf32> to vector<16x64xbf16>
    %c0_51 = arith.constant 0 : index
    %c0_52 = arith.constant 0 : index
    %177 = vector.load %arg3[%c0_51, %c0_52] : memref<64x256xbf16, #tpu.memory_space<vmem>>, vector<64x256xbf16>
    %cst_53 = arith.constant dense<0.000000e+00> : vector<16x256xf32>
    %178 = tpu.matmul %176, %177, %cst_53 {dimension_numbers = #tpu.dot_dimension_numbers<[1], [0], [0], [1], [0, 0, 1, 1], [], []>} : vector<16x64xbf16>, vector<64x256xbf16>, vector<16x256xf32> -> vector<16x256xf32>
    %179 = arith.addf %175, %178 : vector<16x256xf32>
    %180 = arith.negf %179 : vector<16x256xf32>
    %181 = math.exp %180 : vector<16x256xf32>
    %cst_54 = arith.constant 1.000000e+00 : f32
    %182 = vector.broadcast %cst_54 : f32 to vector<16x256xf32>
    %183 = arith.addf %182, %181 : vector<16x256xf32>
    %184 = arith.divf %182, %183 : vector<16x256xf32>
    %185 = vector.extract_strided_slice %184 {offsets = [0, 0], sizes = [16, 64], strides = [1, 1]} : vector<16x256xf32> to vector<16x64xf32>
    %186 = vector.extract_strided_slice %184 {offsets = [0, 64], sizes = [16, 64], strides = [1, 1]} : vector<16x256xf32> to vector<16x64xf32>
    %187 = vector.extract_strided_slice %184 {offsets = [0, 128], sizes = [16, 64], strides = [1, 1]} : vector<16x256xf32> to vector<16x64xf32>
    %188 = vector.extract_strided_slice %179 {offsets = [0, 192], sizes = [16, 64], strides = [1, 1]} : vector<16x256xf32> to vector<16x64xf32>
    %189 = math.tanh %188 : vector<16x64xf32>
    %190 = arith.mulf %186, %169 : vector<16x64xf32>
    %191 = arith.mulf %185, %189 : vector<16x64xf32>
    %192 = arith.addf %190, %191 : vector<16x64xf32>
    %193 = math.tanh %192 : vector<16x64xf32>
    %194 = arith.mulf %187, %193 : vector<16x64xf32>
    %c8_i32 = arith.constant 8 : i32
    %195 = vector.shape_cast %194 : vector<16x64xf32> to vector<1x16x64xf32>
    %c0_55 = arith.constant 0 : index
    %c0_56 = arith.constant 0 : index
    %c0_57 = arith.constant 0 : index
    %196 = vector.load %arg4[%c0_55, %c0_56, %c0_57] : memref<1x16x64xf32, #tpu.memory_space<vmem>>, vector<1x16x64xf32>
    tpu.vector_store %arg4[%c0_55, %c0_56, %c0_57], %195 {strides = array<i32>} : memref<1x16x64xf32, #tpu.memory_space<vmem>>, vector<1x16x64xf32>,
    return
  }
  func.func @transform_0(%arg0: i32) -> (i32, i32, i32) {
    %c0_i32 = arith.constant 0 : i32
    %c0_i32_0 = arith.constant 0 : i32
    %c0_i32_1 = arith.constant 0 : i32
    return %c0_i32, %arg0, %c0_i32_0 : i32, i32, i32
  }
  func.func @transform_1(%arg0: i32) -> (i32, i32) {
    %c0_i32 = arith.constant 0 : i32
    %c0_i32_0 = arith.constant 0 : i32
    %c0_i32_1 = arith.constant 0 : i32
    return %c0_i32, %c0_i32_0 : i32, i32
  }
  func.func @transform_2(%arg0: i32) -> (i32, i32) {
    %c0_i32 = arith.constant 0 : i32
    %c0_i32_0 = arith.constant 0 : i32
    %c0_i32_1 = arith.constant 0 : i32
    return %c0_i32, %c0_i32_0 : i32, i32
  }
  func.func @transform_3(%arg0: i32) -> (i32, i32, i32) {
    %c0_i32 = arith.constant 0 : i32
    %c0_i32_0 = arith.constant 0 : i32
    %c0_i32_1 = arith.constant 0 : i32
    return %c0_i32, %arg0, %c0_i32_0 : i32, i32, i32
  }
}

</mosaic_0001>

<bundles_post_ra>
// kernel: tpu_custom_call.1
= control target key start
LH: loop header
LB: loop body
LE: loop exit
PB: predicated region body
PF: predicated region fallthrough
CT: control target
= control target key end

     0   :  { %8 = vsyncpa [#allocation4], 0  ;;  %s2449_s0 = inlined_call_operand.hbm [shape: s32[8,16,128], index: 0, kind: input, shape index: {}]   ;;  %s2450_s1 = inlined_call_operand.hbm [shape: f32[128,256], index: 1, kind: input, shape index: {}]   ;;  %s2451_s2 = inlined_call_operand.hbm [shape: bf16[64,256], index: 2, kind: input, shape index: {}]   ;;  %s2452_s3 = inlined_call_operand.hbm [shape: f32[1,16,64], index: 3, kind: output, shape index: {}]  }
   0x1   :  { %9 = vsyncpa [#allocation7], 0  ;;  %s28_s14 = sshll.u32 %s2450_s1, 4  ;;  %s29_s14 = int_to_ptr.hbm [resolvable:$true] %s28_s14 }
   0x2   :  { %10 = vsyncpa [#allocation5], 0  ;;  %s2079_s15 = smov [#allocation6]   ;;  %s15_s19 = sshll.u32 %s2449_s0, 4  ;;  %s16_s19 = int_to_ptr.hbm [resolvable:$true] %s15_s19 }
   0x3   :  { %s30_s16 = sshll.u32 %s2079_s15, 4  ;;  %s2080_s20 = smov 256   ;;  %s31_s16 = int_to_ptr.vmem [resolvable:$true] %s30_s16 }
   0x4   :  { %s2081_s21 = smov 16   ;;  %s2082_s22 = smov [#allocation3]  }
   0x5   :  { %36 = dma.hbm_to_vmem [thread:$0]  %s29_s14, 4096, %s31_s16, [#allocation7], %s2080_s20, %s2080_s20, %s2081_s21  }
   0x6   :  { %s17_s23 = sshll.u32 %s2082_s22, 4  ;;  %s2083_s24 = smov 128   ;;  %s18_s23 = int_to_ptr.vmem [resolvable:$true] %s17_s23 }
   0x7   :  { %s2084_s25 = smov 8   ;;  %s41_s27 = sshll.u32 %s2451_s2, 4  ;;  %s42_s27 = int_to_ptr.hbm [resolvable:$true] %s41_s27 }
   0x8   :  { %23 = dma.hbm_to_vmem [thread:$0]  %s16_s19, 2048, %s18_s23, [#allocation4], %s2083_s24, %s2083_s24, %s2084_s25  }
   0x9   :  { %s2085_s28 = smov [#allocation8]  }
   0xa   :  { %s43_s0 = sshll.u32 %s2085_s28, 4  ;;  %s44_s0 = int_to_ptr.vmem [resolvable:$true] %s43_s0 }
   0xb   :  { %49 = dma.hbm_to_vmem [thread:$0]  %s42_s27, 1024, %s44_s0, [#allocation7], %s2083_s24, %s2083_s24, %s2084_s25  }
   0xc   :  { %2073 = dma.done.wait [#allocation4], 2048  }
   0xd   :  { %2074 = vsyncadd [#allocation4], 4294965248 }
   0xe   :  { %2075 = dma.done.wait [#allocation7], 5120  }
   0xf   :  { %2076 = vsyncadd [#allocation7], 4294962176  ;;  %v160_v0 = vld [vmem:[#allocation6 + $0xf8] sm:$0xff]  ;;  %v158_v1 = vld [vmem:[#allocation6 + $0xe8] sm:$0xff]  ;;  %v2086_v38 = vmov 0   ;;  %v79_v43 = vlaneseq  ;;  %v2087_v57 = vmov 1.0  }
  0x10   :  { %v1772_v2 = vld [vmem:[#allocation8 + $0x34] sm:$0xf]  ;;  %226 = vmatpush.msra.mxu1 %v160_v0  ;;  %v1716_v3 = vld [vmem:[#allocation8 + $0x38] sm:$0xf0]  ;;  %v1770_v6 = vld [vmem:[#allocation8 + $0x24] sm:$0xf] }
  0x11   :  { %v2125_v4 = vor.u32 %v1772_v2, %v1716_v3  ;;  %v156_v5 = vld [vmem:[#allocation6 + $0xd8] sm:$0xff]  ;;  %v1708_v7 = vld [vmem:[#allocation8 + $0x28] sm:$0xf0]  ;;  %v1768_v10 = vld [vmem:[#allocation8 + $0x14] sm:$0xf]  ;;  %v2150_v49 = vand.u32 127, %v79_v43 }
  0x12   :  { %227 = vmatpush.msra.mxu1 %v158_v1  ;;  %v154_v8 = vld [vmem:[#allocation6 + $0xc8] sm:$0xff]  ;;  %v2128_v9 = vor.u32 %v1770_v6, %v1708_v7  ;;  %v1700_v11 = vld [vmem:[#allocation8 + $0x18] sm:$0xf0]  ;;  %v159_v15 = vld [vmem:[#allocation6 + $0xf0] sm:$0xff]  ;;  %s2088_s2 = smov 64   ;;  %s2089_s29 = smov [#allocation9]  }
  0x13   :  { %400 = vmatpush.bf16.msra.mxu3 %v2125_v4  ;;  %v152_v12 = vld [vmem:[#allocation6 + $0xb8] sm:$0xff]  ;;  %v150_v13 = vld [vmem:[#allocation6 + $0xa8] sm:$0xff]  ;;  %v2131_v14 = vor.u32 %v1768_v10, %v1700_v11  ;;  %v1766_v16 = vld [vmem:[#allocation8 + $0x4] sm:$0xf]  ;;  %161 = vmatpush.msra.mxu0 %v159_v15  ;;  %s1617_s30 = sshll.u32 %s2089_s29, 4  ;;  %s1619_s6 = sshll.u32 %s2452_s3, 4  ;;  %s1618_s30 = int_to_ptr.vmem [resolvable:$true] %s1617_s30  ;;  %s1620_s6 = int_to_ptr.hbm [resolvable:$true] %s1619_s6 }
  0x14   :  { %228 = vmatpush.msra.mxu1 %v156_v5  ;;  %v1692_v17 = vld [vmem:[#allocation8 + $0x8] sm:$0xf0]  ;;  %v157_v18 = vld [vmem:[#allocation6 + $0xe0] sm:$0xff]  ;;  %v148_v19 = vld [vmem:[#allocation6 + $0x98] sm:$0xff] }
  0x15   :  { %v155_v20 = vld [vmem:[#allocation6 + $0xd0] sm:$0xff]  ;;  %v146_v22 = vld [vmem:[#allocation6 + $0x88] sm:$0xff]  ;;  %162 = vmatpush.msra.mxu0 %v157_v18  ;;  %v1773_v23 = vld [vmem:[#allocation8 + $0x34] sm:$0xf0]  ;;  %v2134_v24 = vor.u32 %v1766_v16, %v1692_v17 }
  0x16   :  { %229 = vmatpush.msra.mxu1 %v154_v8  ;;  %v1714_v21 = vld [vmem:[#allocation8 + $0x30] sm:$0xf]  ;;  %v153_v25 = vld [vmem:[#allocation6 + $0xc0] sm:$0xff]  ;;  %v1771_v28 = vld [vmem:[#allocation8 + $0x24] sm:$0xf0] }
  0x17   :  { %401 = vmatpush.bf16.msra.mxu3 %v2128_v9  ;;  %v2136_v26 = vor.u32 %v1773_v23, %v1714_v21  ;;  %v1706_v27 = vld [vmem:[#allocation8 + $0x20] sm:$0xf]  ;;  %163 = vmatpush.msra.mxu0 %v155_v20  ;;  %v144_v29 = vld [vmem:[#allocation6 + $0x78] sm:$0xff]  ;;  %v151_v30 = vld [vmem:[#allocation6 + $0xb0] sm:$0xff] }
  0x18   :  { %230 = vmatpush.msra.mxu1 %v152_v12  ;;  %v2139_v31 = vor.u32 %v1771_v28, %v1706_v27  ;;  %v1698_v32 = vld [vmem:[#allocation8 + $0x10] sm:$0xf]  ;;  %v1769_v33 = vld [vmem:[#allocation8 + $0x14] sm:$0xf0]  ;;  %v142_v34 = vld [vmem:[#allocation6 + $0x68] sm:$0xff] }
  0x19   :  { %386 = vmatpush.bf16.msra.mxu2 %v2136_v26  ;;  %164 = vmatpush.msra.mxu0 %v153_v25  ;;  %v149_v35 = vld [vmem:[#allocation6 + $0xa0] sm:$0xff]  ;;  %v140_v36 = vld [vmem:[#allocation6 + $0x58] sm:$0xff]  ;;  %v2143_v37 = vor.u32 %v1769_v33, %v1698_v32  ;;  %v147_v39 = vld [vmem:[#allocation6 + $0x90] sm:$0xff] }
  0x1a   :  { %231 = vmatpush.msra.mxu1 %v150_v13  ;;  %v1690_v40 = vld [vmem:[#allocation8] sm:$0xf]  ;;  %v1767_v41 = vld [vmem:[#allocation8 + $0x4] sm:$0xf0]  ;;  %v136_v45 = vld [vmem:[#allocation6 + $0x38] sm:$0xff] }
  0x1b   :  { %402 = vmatpush.bf16.msra.mxu3 %v2131_v14  ;;  %165 = vmatpush.msra.mxu0 %v151_v30  ;;  %v138_v42 = vld [vmem:[#allocation6 + $0x48] sm:$0xff]  ;;  %v145_v44 = vld [vmem:[#allocation6 + $0x80] sm:$0xff]  ;;  %v2147_v46 = vor.u32 %v1767_v41, %v1690_v40  ;;  %v143_v47 = vld [vmem:[#allocation6 + $0x70] sm:$0xff] }
  0x1c   :  { %232 = vmatpush.msra.mxu1 %v148_v19  ;;  %v134_v48 = vld [vmem:[#allocation6 + $0x28] sm:$0xff]  ;;  %v141_v50 = vld [vmem:[#allocation6 + $0x60] sm:$0xff]  ;;  %v132_v51 = vld [vmem:[#allocation6 + $0x18] sm:$0xff] }
  0x1d   :  { %387 = vmatpush.bf16.msra.mxu2 %v2139_v31  ;;  %166 = vmatpush.msra.mxu0 %v149_v35  ;;  %v63_v52 = vld [vmem:[#allocation3] sm:$0xff]  ;;  %v139_v53 = vld [vmem:[#allocation6 + $0x50] sm:$0xff]  ;;  %v130_v54 = vld [vmem:[#allocation6 + $0x8] sm:$0xff] }
  0x1e   :  { %233 = vmatpush.msra.mxu1 %v146_v22  ;;  %vm81_vm0 = vcmp.eq.s32.totalorder %v63_v52, %v2150_v49  ;;  %v137_v55 = vld [vmem:[#allocation6 + $0x40] sm:$0xff]  ;;  %v135_v56 = vld [vmem:[#allocation6 + $0x30] sm:$0xff]  ;;  %v64_v59 = vld [vmem:[#allocation3 + $0x8] sm:$0xff] }
  0x1f   :  { %403 = vmatpush.bf16.msra.mxu3 %v2134_v24  ;;  %167 = vmatpush.msra.mxu0 %v147_v39  ;;  %v133_v58 = vld [vmem:[#allocation6 + $0x20] sm:$0xff]  ;;  %v131_v60 = vld [vmem:[#allocation6 + $0x10] sm:$0xff]  ;;  %vm82_vm1 = vcmp.eq.s32.totalorder %v64_v59, %v2150_v49 }
  0x20   :  { %234 = vmatpush.msra.mxu1 %v144_v29  ;;  %v129_v61 = vld [vmem:[#allocation6] sm:$0xff] }
  0x21   :  { %388 = vmatpush.bf16.msra.mxu2 %v2143_v37  ;;  %168 = vmatpush.msra.mxu0 %v145_v44 }
  0x22   :  { %404 = vmatmul.bf16.vlgmr.msra.gmra.mxu3 %v2086_v38  ;;  %235 = vmatpush.msra.mxu1 %v142_v34 }
  0x23   :  { %555 = vmatpush.bf16.msrb.mxu3 %v2125_v4  ;;  %169 = vmatpush.msra.mxu0 %v143_v47 }
  0x24   :  { %236 = vmatpush.msra.mxu1 %v140_v36 }
  0x25   :  { %389 = vmatpush.bf16.msra.mxu2 %v2147_v46  ;;  %170 = vmatpush.msra.mxu0 %v141_v50 }
  0x26   :  { %237 = vmatpush.msra.mxu1 %v138_v42 }
  0x27   :  { %556 = vmatpush.bf16.msrb.mxu3 %v2128_v9  ;;  %171 = vmatpush.msra.mxu0 %v139_v53 }
  0x28   :  { %238 = vmatpush.msra.mxu1 %v136_v45  ;;  %390 = vmatmul.bf16.vlgmr.msra.gmra.mxu2 %v2086_v38 }
  0x29   :  { %541 = vmatpush.bf16.msrb.mxu2 %v2136_v26  ;;  %172 = vmatpush.msra.mxu0 %v137_v55 }
  0x2a   :  { %239 = vmatpush.msra.mxu1 %v134_v48 }
  0x2b   :  { %557 = vmatpush.bf16.msrb.mxu3 %v2131_v14  ;;  %173 = vmatpush.msra.mxu0 %v135_v56 }
  0x2c   :  { %240 = vmatpush.msra.mxu1 %v132_v51 }
  0x2d   :  { %542 = vmatpush.bf16.msrb.mxu2 %v2139_v31  ;;  %174 = vmatpush.msra.mxu0 %v133_v58 }
  0x2e   :  { %241 = vmatpush.msra.mxu1 %v130_v54 }
  0x2f   :  { %1672 = vmatmul.msk.f32.vlgmr.msra.gmra.mxu1 %vm81_vm0, %v2087_v57  ;;  %558 = vmatpush.bf16.msrb.mxu3 %v2134_v24 }
  0x30   :  { %175 = vmatpush.msra.mxu0 %v131_v60 }
  0x31   :  { %543 = vmatpush.bf16.msrb.mxu2 %v2143_v37 }
  0x32   :  { %176 = vmatpush.msra.mxu0 %v129_v61 }
  0x33   :  { %710 = vmatpush.bf16.msra.mxu3 %v2125_v4  ;;  %1656 = vmatmul.msk.f32.vlgmr.msra.gmra.mxu0 %vm81_vm0, %v2087_v57 }
  0x35   :  { %544 = vmatpush.bf16.msrb.mxu2 %v2147_v46 }
  0x37   :  { %711 = vmatpush.bf16.msra.mxu3 %v2128_v9  ;;  %1673 = vmatmul.msk.f32.gmra.mxu1 %vm82_vm1, %v2087_v57 }
  0x39   :  { %696 = vmatpush.bf16.msra.mxu2 %v2136_v26 }
  0x3b   :  { %712 = vmatpush.bf16.msra.mxu3 %v2131_v14  ;;  %1657 = vmatmul.msk.f32.gmra.mxu0 %vm82_vm1, %v2087_v57 }
  0x3d   :  { %697 = vmatpush.bf16.msra.mxu2 %v2139_v31 }
  0x3f   :  { %713 = vmatpush.bf16.msra.mxu3 %v2134_v24 }
  0x41   :  { %698 = vmatpush.bf16.msra.mxu2 %v2143_v37 }
  0x45   :  { %699 = vmatpush.bf16.msra.mxu2 %v2147_v46 }
  0xa5   :  { %v405_v62 = vpop.f32.mrf.mxu3 }
  0xab   :  { %v391_v8 = vpop.f32.mrf.mxu2 }
  0xac   :  { %v243_v63 = vpop.f32.mrf.mxu1 }
  0xad   :  { %v2177_v0 = vadd.f32 %v405_v62, %v243_v63  ;;  %v407_v1 = vpop.f32.mrf.mxu3 }
  0xaf   :  { %1785 = vtanh.f32 %v2177_v0  ;;  %v1721_v60 = vmul.f32 -1.442695, %v2177_v0 }
  0xb0   :  { %v178_v7 = vpop.f32.mrf.mxu0 }
  0xb1   :  { %v410_v10 = vadd.f32 %v391_v8, %v178_v7  ;;  %v66_v7 = vld [vmem:[#allocation3 + $0x18] sm:$0xff] }
  0xb2   :  { %vm84_vm11 = vcmp.eq.s32.totalorder %v66_v7, %v2150_v49 }
  0xb3   :  { %v1720_v11 = vmul.f32 -1.442695, %v410_v10  ;;  %v393_v13 = vpop.f32.mrf.mxu2 }
  0xb4   :  { %v246_v2 = vpop.f32.mrf.mxu1 }
  0xb5   :  { %v1786_v3 = vpop.eup %1785  ;;  %v2180_v5 = vadd.f32 %v407_v1, %v246_v2 }
  0xb6   :  { %496 = vrot.lane.b32.xlu0 %v1786_v3, %s2088_s2  ;;  %v65_v3 = vld [vmem:[#allocation3 + $0x10] sm:$0xff] }
  0xb7   :  { %1787 = vtanh.f32 %v2180_v5  ;;  %v1723_v61 = vmul.f32 -1.442695, %v2180_v5  ;;  %vm83_vm10 = vcmp.eq.s32.totalorder %v65_v3, %v2150_v49 }
  0xb8   :  { %v181_v12 = vpop.f32.mrf.mxu0  ;;  %1789 = vpow2.f32 %v1720_v11  ;;  %1658 = vmatmul.msk.f32.gmra.mxu0 %vm83_vm10, %v2087_v57  ;;  %1674 = vmatmul.msk.f32.gmra.mxu1 %vm83_vm10, %v2087_v57 }
  0xb9   :  { %v412_v15 = vadd.f32 %v393_v13, %v181_v12 }
  0xbb   :  { %v1722_v16 = vmul.f32 -1.442695, %v412_v15 }
  0xbd   :  { %v1788_v6 = vpop.eup %1787  ;;  %1791 = vpow2.f32 %v1722_v16 }
  0xbe   :  { %498 = vrot.lane.b32.xlu0 %v1788_v6, %s2088_s2  ;;  %v1790_v17 = vpop.eup %1789 }
  0xbf   :  { %v426_v18 = vadd.f32 1.0, %v1790_v17 }
  0xc0   :  { %1659 = vmatmul.msk.f32.gmra.mxu0 %vm84_vm11, %v2087_v57  ;;  %1675 = vmatmul.msk.f32.gmra.mxu1 %vm84_vm11, %v2087_v57 }
  0xc1   :  { %1793 = vrcp.f32 %v426_v18  ;;  %vm435_vm2 = vweird.f32 %v426_v18  ;;  %v441_v29 = vand.u32 2147483648, %v426_v18  ;;  %v439_v32 = vand.u32 2147483647, %v426_v18 }
  0xc3   :  { %v1792_v19 = vpop.eup %1791  ;;  %v442_v34 = vor.u32 1.1754944e-38, %v441_v29  ;;  %vm440_vm5 = vcmp.eq.f32.partialorder %v439_v32, 8.507059e+37 }
  0xc4   :  { %v428_v20 = vadd.f32 1.0, %v1792_v19 }
  0xc6   :  { %1795 = vrcp.f32 %v428_v20  ;;  %vm465_vm6 = vweird.f32 %v428_v20  ;;  %v471_v40 = vand.u32 2147483648, %v428_v20  ;;  %v469_v43 = vand.u32 2147483647, %v428_v20 }
  0xc7   :  { %v1794_v21 = vpop.eup %1793 }
  0xc8   :  { %v431_v22 = vmul.f32 %v1794_v21, %v426_v18  ;;  %vm436_vm3 = vweird.f32 %v1794_v21  ;;  %v472_v44 = vor.u32 1.1754944e-38, %v471_v40  ;;  %vm470_vm9 = vcmp.eq.f32.partialorder %v469_v43, 8.507059e+37 }
  0xc9   :  { %vm437_vm4 = vmor %vm435_vm2, %vm436_vm3 }
  0xca   :  { %v432_v23 = vsub.f32 1.0, %v431_v22 }
  0xcc   :  { %v1796_v25 = vpop.eup %1795  ;;  %v433_v27 = vmul.f32 %v1794_v21, %v432_v23 }
  0xcd   :  { %v461_v28 = vmul.f32 %v1796_v25, %v428_v20  ;;  %vm466_vm7 = vweird.f32 %v1796_v25 }
  0xce   :  { %v434_v30 = vadd.f32 %v1794_v21, %v433_v27  ;;  %vm467_vm8 = vmor %vm465_vm6, %vm466_vm7 }
  0xcf   :  { %v462_v33 = vsub.f32 1.0, %v461_v28 }
  0xd0   :  { %v438_v35 = vsel %vm437_vm4, %v1794_v21, %v434_v30  ;;  %vm378_vm4 = vcmask 523264  }
  0xd1   :  { %v463_v36 = vmul.f32 %v1796_v25, %v462_v33  ;;  %v443_v39 = vsel %vm440_vm5, %v442_v34, %v438_v35 }
  0xd2   :  { %v492_v51 = vmul.f32 0.0, %v443_v39 }
  0xd3   :  { %v464_v42 = vadd.f32 %v1796_v25, %v463_v36 }
  0xd5   :  { %v468_v45 = vsel %vm467_vm8, %v1796_v25, %v464_v42 }
  0xd6   :  { %v473_v48 = vsel %vm470_vm9, %v472_v44, %v468_v45 }
  0xd7   :  { %v493_v54 = vmul.f32 0.0, %v473_v48 }
 0x128   :  { %v497_v38 = vpop.permute.xlu0 %496 }
 0x129   :  { %v502_v41 = vmul.f32 %v497_v38, %v443_v39 }
 0x12b   :  { %506 = vrot.lane.b32.xlu1 %v502_v41, %s2088_s2 }
 0x130   :  { %v499_v47 = vpop.permute.xlu0 %498 }
 0x131   :  { %v503_v50 = vmul.f32 %v499_v47, %v473_v48 }
 0x133   :  { %508 = vrot.lane.b32.xlu1 %v503_v50, %s2088_s2 }
 0x135   :  { %v249_v35 = vpop.f32.mrf.mxu1  ;;  %v184_v44 = vpop.f32.mrf.mxu0 }
 0x13d   :  { %v252_v39 = vpop.f32.mrf.mxu1  ;;  %v187_v50 = vpop.f32.mrf.mxu0 }
 0x19d   :  { %v507_v52 = vpop.permute.xlu1 %506 }
 0x19e   :  { %v2187_v53 = vadd.f32 %v507_v52, %v492_v51 }
 0x1a0   :  { %1797 = vtanh.f32 %v2187_v53 }
 0x1a5   :  { %v509_v55 = vpop.permute.xlu1 %508 }
 0x1a6   :  { %v1798_v56 = vpop.eup %1797  ;;  %v2190_v58 = vadd.f32 %v509_v55, %v493_v54 }
 0x1a7   :  { %518 = vrot.lane.b32.xlu2 %v1798_v56, %s2088_s2 }
 0x1a8   :  { %1799 = vtanh.f32 %v2190_v58 }
 0x1a9   :  { %1801 = vpow2.f32 %v1721_v60 }
 0x1aa   :  { %1803 = vpow2.f32 %v1723_v61 }
 0x1ae   :  { %v1800_v59 = vpop.eup %1799 }
 0x1af   :  { %520 = vrot.lane.b32.xlu2 %v1800_v59, %s2088_s2  ;;  %v1802_v62 = vpop.eup %1801 }
 0x1b0   :  { %v1804_v63 = vpop.eup %1803  ;;  %v427_v1 = vadd.f32 1.0, %v1802_v62 }
 0x1b1   :  { %v429_v2 = vadd.f32 1.0, %v1804_v63 }
 0x1b2   :  { %1805 = vrcp.f32 %v427_v1  ;;  %vm450_vm14 = vweird.f32 %v427_v1  ;;  %v456_v18 = vand.u32 2147483648, %v427_v1  ;;  %v454_v20 = vand.u32 2147483647, %v427_v1 }
 0x1b3   :  { %1807 = vrcp.f32 %v429_v2  ;;  %v486_v19 = vand.u32 2147483648, %v429_v2  ;;  %vm480_vm0 = vweird.f32 %v429_v2  ;;  %v484_v21 = vand.u32 2147483647, %v429_v2 }
 0x1b4   :  { %v457_v25 = vor.u32 1.1754944e-38, %v456_v18  ;;  %vm455_vm2 = vcmp.eq.f32.partialorder %v454_v20, 8.507059e+37 }
 0x1b5   :  { %v487_v27 = vor.u32 1.1754944e-38, %v486_v19  ;;  %vm485_vm3 = vcmp.eq.f32.partialorder %v484_v21, 8.507059e+37 }
 0x1b8   :  { %v1806_v6 = vpop.eup %1805 }
 0x1b9   :  { %v1808_v0 = vpop.eup %1807  ;;  %v446_v5 = vmul.f32 %v1806_v6, %v427_v1  ;;  %vm451_vm12 = vweird.f32 %v1806_v6 }
 0x1ba   :  { %v476_v8 = vmul.f32 %v1808_v0, %v429_v2  ;;  %vm481_vm13 = vweird.f32 %v1808_v0  ;;  %vm452_vm15 = vmor %vm450_vm14, %vm451_vm12 }
 0x1bb   :  { %v447_v10 = vsub.f32 1.0, %v446_v5  ;;  %vm482_vm1 = vmor %vm480_vm0, %vm481_vm13 }
 0x1bc   :  { %v477_v11 = vsub.f32 1.0, %v476_v8 }
 0x1bd   :  { %v448_v12 = vmul.f32 %v1806_v6, %v447_v10 }
 0x1be   :  { %v478_v13 = vmul.f32 %v1808_v0, %v477_v11 }
 0x1bf   :  { %v449_v16 = vadd.f32 %v1806_v6, %v448_v12 }
 0x1c0   :  { %v479_v17 = vadd.f32 %v1808_v0, %v478_v13 }
 0x1c1   :  { %v453_v22 = vsel %vm452_vm15, %v1806_v6, %v449_v16 }
 0x1c2   :  { %v483_v23 = vsel %vm482_vm1, %v1808_v0, %v479_v17  ;;  %v458_v28 = vsel %vm455_vm2, %v457_v25, %v453_v22 }
 0x1c3   :  { %v488_v29 = vsel %vm485_vm3, %v487_v27, %v483_v23 }
 0x201   :  { %v519_v15 = vpop.permute.xlu2 %518 }
 0x202   :  { %v524_v32 = vmul.f32 %v519_v15, %v458_v28 }
 0x209   :  { %v521_v30 = vpop.permute.xlu2 %520 }
 0x20a   :  { %v525_v33 = vmul.f32 %v521_v30, %v488_v29 }
 0x20c   :  { %v533_v34 = vpack.c.bf16 %v525_v33, %v524_v32 }
 0x20e   :  { %1724 = vmatmul.msk.bf16.vlgmr.msrb.gmra.mxu2 %vm378_vm4, %v533_v34  ;;  %1725 = vmatmul.msk.bf16.vlgmr.msrb.gmra.mxu3 %vm378_vm4, %v533_v34 }
 0x20f   :  { %865 = vmatpush.bf16.msrb.mxu3 %v2125_v4  ;;  %851 = vmatpush.bf16.msrb.mxu2 %v2136_v26 }
 0x213   :  { %866 = vmatpush.bf16.msrb.mxu3 %v2128_v9  ;;  %852 = vmatpush.bf16.msrb.mxu2 %v2139_v31 }
 0x217   :  { %867 = vmatpush.bf16.msrb.mxu3 %v2131_v14  ;;  %853 = vmatpush.bf16.msrb.mxu2 %v2143_v37 }
 0x21b   :  { %868 = vmatpush.bf16.msrb.mxu3 %v2134_v24  ;;  %854 = vmatpush.bf16.msrb.mxu2 %v2147_v46 }
 0x291   :  { %v560_v36 = vpop.f32.mrf.mxu3  ;;  %v546_v45 = vpop.f32.mrf.mxu2 }
 0x292   :  { %v2213_v38 = vadd.f32 %v560_v36, %v249_v35  ;;  %v565_v47 = vadd.f32 %v546_v45, %v184_v44  ;;  %v68_v44 = vld [vmem:[#allocation3 + $0x28] sm:$0xff] }
 0x293   :  { %vm86_vm14 = vcmp.eq.s32.totalorder %v68_v44, %v2150_v49 }
 0x294   :  { %1809 = vtanh.f32 %v2213_v38  ;;  %v1726_v48 = vmul.f32 -1.442695, %v565_v47 }
 0x299   :  { %v562_v40 = vpop.f32.mrf.mxu3  ;;  %v548_v51 = vpop.f32.mrf.mxu2 }
 0x29a   :  { %v1810_v41 = vpop.eup %1809  ;;  %v2216_v42 = vadd.f32 %v562_v40, %v252_v39  ;;  %v567_v52 = vadd.f32 %v548_v51, %v187_v50 }
 0x29b   :  { %651 = vrot.lane.b32.xlu0 %v1810_v41, %s2088_s2 }
 0x29c   :  { %1811 = vtanh.f32 %v2216_v42  ;;  %v1728_v54 = vmul.f32 -1.442695, %v567_v52  ;;  %v1729_v35 = vmul.f32 -1.442695, %v2216_v42 }
 0x29d   :  { %1813 = vpow2.f32 %v1726_v48 }
 0x29e   :  { %1815 = vpow2.f32 %v1728_v54 }
 0x2a2   :  { %v1812_v43 = vpop.eup %1811 }
 0x2a3   :  { %653 = vrot.lane.b32.xlu1 %v1812_v43, %s2088_s2  ;;  %v1814_v55 = vpop.eup %1813 }
 0x2a4   :  { %v581_v56 = vadd.f32 1.0, %v1814_v55  ;;  %v1816_v59 = vpop.eup %1815 }
 0x2a5   :  { %v583_v60 = vadd.f32 1.0, %v1816_v59 }
 0x2a6   :  { %1817 = vrcp.f32 %v581_v56  ;;  %v596_v0 = vand.u32 2147483648, %v581_v56  ;;  %vm590_vm6 = vweird.f32 %v581_v56  ;;  %v594_v5 = vand.u32 2147483647, %v581_v56 }
 0x2a7   :  { %1819 = vrcp.f32 %v583_v60  ;;  %v626_v17 = vand.u32 2147483648, %v583_v60  ;;  %vm620_vm10 = vweird.f32 %v583_v60  ;;  %v624_v18 = vand.u32 2147483647, %v583_v60 }
 0x2a8   :  { %v597_v11 = vor.u32 1.1754944e-38, %v596_v0  ;;  %vm595_vm8 = vcmp.eq.f32.partialorder %v594_v5, 8.507059e+37 }
 0x2a9   :  { %v627_v20 = vor.u32 1.1754944e-38, %v626_v17  ;;  %vm625_vm12 = vcmp.eq.f32.partialorder %v624_v18, 8.507059e+37 }
 0x2ac   :  { %v1818_v61 = vpop.eup %1817 }
 0x2ad   :  { %v586_v62 = vmul.f32 %v1818_v61, %v581_v56  ;;  %v1820_v1 = vpop.eup %1819  ;;  %vm591_vm5 = vweird.f32 %v1818_v61 }
 0x2ae   :  { %v616_v3 = vmul.f32 %v1820_v1, %v583_v60  ;;  %vm592_vm7 = vmor %vm590_vm6, %vm591_vm5  ;;  %vm621_vm9 = vweird.f32 %v1820_v1 }
 0x2af   :  { %v587_v63 = vsub.f32 1.0, %v586_v62  ;;  %vm622_vm11 = vmor %vm620_vm10, %vm621_vm9 }
 0x2b0   :  { %v617_v7 = vsub.f32 1.0, %v616_v3 }
 0x2b1   :  { %v588_v2 = vmul.f32 %v1818_v61, %v587_v63 }
 0x2b2   :  { %v618_v10 = vmul.f32 %v1820_v1, %v617_v7 }
 0x2b3   :  { %v589_v6 = vadd.f32 %v1818_v61, %v588_v2 }
 0x2b4   :  { %v619_v16 = vadd.f32 %v1820_v1, %v618_v10 }
 0x2b5   :  { %v593_v8 = vsel %vm592_vm7, %v1818_v61, %v589_v6 }
 0x2b6   :  { %v598_v13 = vsel %vm595_vm8, %v597_v11, %v593_v8  ;;  %v623_v19 = vsel %vm622_vm11, %v1820_v1, %v619_v16 }
 0x2b7   :  { %v628_v22 = vsel %vm625_vm12, %v627_v20, %v623_v19  ;;  %v647_v25 = vmul.f32 %v598_v13, %v2187_v53  ;;  %v1727_v53 = vmul.f32 -1.442695, %v2213_v38 }
 0x2b8   :  { %v648_v30 = vmul.f32 %v628_v22, %v2190_v58  ;;  %v67_v58 = vld [vmem:[#allocation3 + $0x20] sm:$0xff] }
 0x2b9   :  { %vm85_vm13 = vcmp.eq.s32.totalorder %v67_v58, %v2150_v49 }
 0x2ba   :  { %1660 = vmatmul.msk.f32.gmra.mxu0 %vm85_vm13, %v2087_v57  ;;  %1676 = vmatmul.msk.f32.gmra.mxu1 %vm85_vm13, %v2087_v57 }
 0x2c2   :  { %1661 = vmatmul.msk.f32.gmra.mxu0 %vm86_vm14, %v2087_v57  ;;  %1677 = vmatmul.msk.f32.gmra.mxu1 %vm86_vm14, %v2087_v57 }
 0x30d   :  { %v652_v12 = vpop.permute.xlu0 %651 }
 0x30e   :  { %v657_v15 = vmul.f32 %v652_v12, %v598_v13 }
 0x310   :  { %661 = vrot.lane.b32.xlu2 %v657_v15, %s2088_s2 }
 0x315   :  { %v654_v21 = vpop.permute.xlu1 %653 }
 0x316   :  { %v658_v23 = vmul.f32 %v654_v21, %v628_v22 }
 0x318   :  { %663 = vrot.lane.b32.xlu0 %v658_v23, %s2088_s2 }
 0x337   :  { %v255_v10 = vpop.f32.mrf.mxu1  ;;  %v190_v19 = vpop.f32.mrf.mxu0 }
 0x33f   :  { %v258_v13 = vpop.f32.mrf.mxu1  ;;  %v193_v23 = vpop.f32.mrf.mxu0 }
 0x36a   :  { %v662_v27 = vpop.permute.xlu2 %661 }
 0x36b   :  { %v2224_v28 = vadd.f32 %v662_v27, %v647_v25 }
 0x36d   :  { %1821 = vtanh.f32 %v2224_v28 }
 0x373   :  { %v1822_v29 = vpop.eup %1821 }
 0x374   :  { %673 = vrot.lane.b32.xlu1 %v1822_v29, %s2088_s2 }
 0x38a   :  { %v664_v32 = vpop.permute.xlu0 %663 }
 0x38b   :  { %v2229_v33 = vadd.f32 %v664_v32, %v648_v30 }
 0x38d   :  { %1823 = vtanh.f32 %v2229_v33 }
 0x38e   :  { %1825 = vpow2.f32 %v1727_v53 }
 0x38f   :  { %1827 = vpow2.f32 %v1729_v35 }
 0x393   :  { %v1824_v34 = vpop.eup %1823 }
 0x394   :  { %675 = vrot.lane.b32.xlu2 %v1824_v34, %s2088_s2  ;;  %v1826_v36 = vpop.eup %1825 }
 0x395   :  { %v1828_v39 = vpop.eup %1827  ;;  %v582_v40 = vadd.f32 1.0, %v1826_v36 }
 0x396   :  { %v584_v41 = vadd.f32 1.0, %v1828_v39 }
 0x397   :  { %1829 = vrcp.f32 %v582_v40  ;;  %vm605_vm1 = vweird.f32 %v582_v40  ;;  %v611_v55 = vand.u32 2147483648, %v582_v40  ;;  %v609_v59 = vand.u32 2147483647, %v582_v40 }
 0x398   :  { %1831 = vrcp.f32 %v584_v41  ;;  %v641_v56 = vand.u32 2147483648, %v584_v41  ;;  %vm635_vm3 = vweird.f32 %v584_v41  ;;  %v639_v60 = vand.u32 2147483647, %v584_v41 }
 0x399   :  { %v612_v63 = vor.u32 1.1754944e-38, %v611_v55  ;;  %vm610_vm6 = vcmp.eq.f32.partialorder %v609_v59, 8.507059e+37 }
 0x39a   :  { %v642_v2 = vor.u32 1.1754944e-38, %v641_v56  ;;  %vm640_vm7 = vcmp.eq.f32.partialorder %v639_v60, 8.507059e+37 }
 0x39d   :  { %v1830_v43 = vpop.eup %1829 }
 0x39e   :  { %v1832_v38 = vpop.eup %1831  ;;  %v601_v42 = vmul.f32 %v1830_v43, %v582_v40  ;;  %vm606_vm15 = vweird.f32 %v1830_v43 }
 0x39f   :  { %v631_v45 = vmul.f32 %v1832_v38, %v584_v41  ;;  %vm636_vm0 = vweird.f32 %v1832_v38  ;;  %vm607_vm2 = vmor %vm605_vm1, %vm606_vm15 }
 0x3a0   :  { %v602_v47 = vsub.f32 1.0, %v601_v42  ;;  %vm637_vm5 = vmor %vm635_vm3, %vm636_vm0 }
 0x3a1   :  { %v632_v48 = vsub.f32 1.0, %v631_v45 }
 0x3a2   :  { %v603_v50 = vmul.f32 %v1830_v43, %v602_v47 }
 0x3a3   :  { %v633_v51 = vmul.f32 %v1832_v38, %v632_v48 }
 0x3a4   :  { %v604_v52 = vadd.f32 %v1830_v43, %v603_v50 }
 0x3a5   :  { %v634_v54 = vadd.f32 %v1832_v38, %v633_v51 }
 0x3a6   :  { %v608_v61 = vsel %vm607_vm2, %v1830_v43, %v604_v52 }
 0x3a7   :  { %v638_v62 = vsel %vm637_vm5, %v1832_v38, %v634_v54  ;;  %v613_v3 = vsel %vm610_vm6, %v612_v63, %v608_v61 }
 0x3a8   :  { %v643_v6 = vsel %vm640_vm7, %v642_v2, %v638_v62 }
 0x3e6   :  { %v674_v1 = vpop.permute.xlu1 %673 }
 0x3e7   :  { %v679_v0 = vmul.f32 %v674_v1, %v613_v3 }
 0x3ee   :  { %v676_v7 = vpop.permute.xlu2 %675 }
 0x3ef   :  { %v680_v5 = vmul.f32 %v676_v7, %v643_v6 }
 0x3f1   :  { %v688_v8 = vpack.c.bf16 %v680_v5, %v679_v0 }
 0x3f3   :  { %1730 = vmatmul.msk.bf16.vlgmr.msra.gmra.mxu2 %vm378_vm4, %v688_v8  ;;  %1731 = vmatmul.msk.bf16.vlgmr.msra.gmra.mxu3 %vm378_vm4, %v688_v8 }
 0x3f4   :  { %1020 = vmatpush.bf16.msra.mxu3 %v2125_v4  ;;  %1006 = vmatpush.bf16.msra.mxu2 %v2136_v26 }
 0x3f8   :  { %1021 = vmatpush.bf16.msra.mxu3 %v2128_v9  ;;  %1007 = vmatpush.bf16.msra.mxu2 %v2139_v31 }
 0x3fc   :  { %1022 = vmatpush.bf16.msra.mxu3 %v2131_v14  ;;  %1008 = vmatpush.bf16.msra.mxu2 %v2143_v37 }
 0x400   :  { %1023 = vmatpush.bf16.msra.mxu3 %v2134_v24  ;;  %1009 = vmatpush.bf16.msra.mxu2 %v2147_v46 }
 0x476   :  { %v715_v11 = vpop.f32.mrf.mxu3  ;;  %v701_v20 = vpop.f32.mrf.mxu2 }
 0x477   :  { %v2251_v12 = vadd.f32 %v715_v11, %v255_v10  ;;  %v720_v21 = vadd.f32 %v701_v20, %v190_v19  ;;  %v70_v19 = vld [vmem:[#allocation3 + $0x38] sm:$0xff] }
 0x478   :  { %vm88_vm1 = vcmp.eq.s32.totalorder %v70_v19, %v2150_v49 }
 0x479   :  { %1833 = vtanh.f32 %v2251_v12  ;;  %v1732_v22 = vmul.f32 -1.442695, %v720_v21 }
 0x47e   :  { %v717_v15 = vpop.f32.mrf.mxu3  ;;  %v703_v25 = vpop.f32.mrf.mxu2 }
 0x47f   :  { %v1834_v16 = vpop.eup %1833  ;;  %v2254_v17 = vadd.f32 %v717_v15, %v258_v13  ;;  %v722_v27 = vadd.f32 %v703_v25, %v193_v23 }
 0x480   :  { %806 = vrot.lane.b32.xlu0 %v1834_v16, %s2088_s2 }
 0x481   :  { %1835 = vtanh.f32 %v2254_v17  ;;  %v1734_v29 = vmul.f32 -1.442695, %v722_v27  ;;  %v1735_v10 = vmul.f32 -1.442695, %v2254_v17 }
 0x482   :  { %1837 = vpow2.f32 %v1732_v22 }
 0x483   :  { %1839 = vpow2.f32 %v1734_v29 }
 0x487   :  { %v1836_v18 = vpop.eup %1835 }
 0x488   :  { %808 = vrot.lane.b32.xlu1 %v1836_v18, %s2088_s2  ;;  %v1838_v30 = vpop.eup %1837 }
 0x489   :  { %v736_v32 = vadd.f32 1.0, %v1838_v30  ;;  %v1840_v34 = vpop.eup %1839 }
 0x48a   :  { %v738_v53 = vadd.f32 1.0, %v1840_v34 }
 0x48b   :  { %1841 = vrcp.f32 %v736_v32  ;;  %v751_v38 = vand.u32 2147483648, %v736_v32  ;;  %vm745_vm9 = vweird.f32 %v736_v32  ;;  %v749_v42 = vand.u32 2147483647, %v736_v32 }
 0x48c   :  { %1843 = vrcp.f32 %v738_v53  ;;  %v781_v55 = vand.u32 2147483648, %v738_v53  ;;  %vm775_vm13 = vweird.f32 %v738_v53  ;;  %v779_v56 = vand.u32 2147483647, %v738_v53 }
 0x48d   :  { %v752_v48 = vor.u32 1.1754944e-38, %v751_v38  ;;  %vm750_vm11 = vcmp.eq.f32.partialorder %v749_v42, 8.507059e+37 }
 0x48e   :  { %v782_v60 = vor.u32 1.1754944e-38, %v781_v55  ;;  %vm780_vm15 = vcmp.eq.f32.partialorder %v779_v56, 8.507059e+37 }
 0x491   :  { %v1842_v35 = vpop.eup %1841 }
 0x492   :  { %v741_v36 = vmul.f32 %v1842_v35, %v736_v32  ;;  %v1844_v40 = vpop.eup %1843  ;;  %vm746_vm8 = vweird.f32 %v1842_v35 }
 0x493   :  { %v771_v58 = vmul.f32 %v1844_v40, %v738_v53  ;;  %vm747_vm10 = vmor %vm745_vm9, %vm746_vm8  ;;  %vm776_vm12 = vweird.f32 %v1844_v40 }
 0x494   :  { %v742_v39 = vsub.f32 1.0, %v741_v36  ;;  %vm777_vm14 = vmor %vm775_vm13, %vm776_vm12 }
 0x495   :  { %v772_v44 = vsub.f32 1.0, %v771_v58 }
 0x496   :  { %v743_v41 = vmul.f32 %v1842_v35, %v742_v39 }
 0x497   :  { %v773_v47 = vmul.f32 %v1844_v40, %v772_v44 }
 0x498   :  { %v744_v43 = vadd.f32 %v1842_v35, %v743_v41 }
 0x499   :  { %v774_v54 = vadd.f32 %v1844_v40, %v773_v47 }
 0x49a   :  { %v748_v45 = vsel %vm747_vm10, %v1842_v35, %v744_v43 }
 0x49b   :  { %v753_v51 = vsel %vm750_vm11, %v752_v48, %v748_v45  ;;  %v778_v59 = vsel %vm777_vm14, %v1844_v40, %v774_v54 }
 0x49c   :  { %v783_v62 = vsel %vm780_vm15, %v782_v60, %v778_v59  ;;  %v802_v1 = vmul.f32 %v753_v51, %v2224_v28  ;;  %v1733_v28 = vmul.f32 -1.442695, %v2251_v12 }
 0x49d   :  { %v803_v7 = vmul.f32 %v783_v62, %v2229_v33  ;;  %v69_v33 = vld [vmem:[#allocation3 + $0x30] sm:$0xff] }
 0x49e   :  { %vm87_vm0 = vcmp.eq.s32.totalorder %v69_v33, %v2150_v49 }
 0x49f   :  { %1662 = vmatmul.msk.f32.gmra.mxu0 %vm87_vm0, %v2087_v57  ;;  %1678 = vmatmul.msk.f32.gmra.mxu1 %vm87_vm0, %v2087_v57 }
 0x4a7   :  { %1663 = vmatmul.msk.f32.gmra.mxu0 %vm88_vm1, %v2087_v57  ;;  %1679 = vmatmul.msk.f32.gmra.mxu1 %vm88_vm1, %v2087_v57 }
 0x4f2   :  { %v807_v50 = vpop.permute.xlu0 %806 }
 0x4f3   :  { %v812_v52 = vmul.f32 %v807_v50, %v753_v51 }
 0x4f5   :  { %816 = vrot.lane.b32.xlu2 %v812_v52, %s2088_s2 }
 0x4fa   :  { %v809_v61 = vpop.permute.xlu1 %808 }
 0x4fb   :  { %v813_v63 = vmul.f32 %v809_v61, %v783_v62 }
 0x4fd   :  { %818 = vrot.lane.b32.xlu0 %v813_v63, %s2088_s2 }
 0x51c   :  { %v261_v47 = vpop.f32.mrf.mxu1  ;;  %v196_v59 = vpop.f32.mrf.mxu0 }
 0x524   :  { %v264_v51 = vpop.f32.mrf.mxu1  ;;  %v199_v63 = vpop.f32.mrf.mxu0 }
 0x54f   :  { %v817_v2 = vpop.permute.xlu2 %816 }
 0x550   :  { %v2262_v3 = vadd.f32 %v817_v2, %v802_v1 }
 0x552   :  { %1845 = vtanh.f32 %v2262_v3 }
 0x558   :  { %v1846_v6 = vpop.eup %1845 }
 0x559   :  { %828 = vrot.lane.b32.xlu1 %v1846_v6, %s2088_s2 }
 0x56f   :  { %v819_v0 = vpop.permute.xlu0 %818 }
 0x570   :  { %v2267_v5 = vadd.f32 %v819_v0, %v803_v7 }
 0x572   :  { %1847 = vtanh.f32 %v2267_v5 }
 0x573   :  { %1849 = vpow2.f32 %v1733_v28 }
 0x574   :  { %1851 = vpow2.f32 %v1735_v10 }
 0x578   :  { %v1848_v8 = vpop.eup %1847 }
 0x579   :  { %830 = vrot.lane.b32.xlu2 %v1848_v8, %s2088_s2  ;;  %v1850_v11 = vpop.eup %1849 }
 0x57a   :  { %v1852_v13 = vpop.eup %1851  ;;  %v737_v15 = vadd.f32 1.0, %v1850_v11 }
 0x57b   :  { %v739_v16 = vadd.f32 1.0, %v1852_v13 }
 0x57c   :  { %1853 = vrcp.f32 %v737_v15  ;;  %vm760_vm5 = vweird.f32 %v737_v15  ;;  %v766_v30 = vand.u32 2147483648, %v737_v15  ;;  %v764_v34 = vand.u32 2147483647, %v737_v15 }
 0x57d   :  { %1855 = vrcp.f32 %v739_v16  ;;  %v796_v32 = vand.u32 2147483648, %v739_v16  ;;  %vm790_vm7 = vweird.f32 %v739_v16  ;;  %v794_v53 = vand.u32 2147483647, %v739_v16 }
 0x57e   :  { %v767_v39 = vor.u32 1.1754944e-38, %v766_v30  ;;  %vm765_vm9 = vcmp.eq.f32.partialorder %v764_v34, 8.507059e+37 }
 0x57f   :  { %v797_v41 = vor.u32 1.1754944e-38, %v796_v32  ;;  %vm795_vm10 = vcmp.eq.f32.partialorder %v794_v53, 8.507059e+37 }
 0x582   :  { %v1854_v18 = vpop.eup %1853 }
 0x583   :  { %v1856_v12 = vpop.eup %1855  ;;  %v756_v17 = vmul.f32 %v1854_v18, %v737_v15  ;;  %vm761_vm2 = vweird.f32 %v1854_v18 }
 0x584   :  { %v786_v20 = vmul.f32 %v1856_v12, %v739_v16  ;;  %vm791_vm3 = vweird.f32 %v1856_v12  ;;  %vm762_vm6 = vmor %vm760_vm5, %vm761_vm2 }
 0x585   :  { %v757_v21 = vsub.f32 1.0, %v756_v17  ;;  %vm792_vm8 = vmor %vm790_vm7, %vm791_vm3 }
 0x586   :  { %v787_v22 = vsub.f32 1.0, %v786_v20 }
 0x587   :  { %v758_v23 = vmul.f32 %v1854_v18, %v757_v21 }
 0x588   :  { %v788_v25 = vmul.f32 %v1856_v12, %v787_v22 }
 0x589   :  { %v759_v27 = vadd.f32 %v1854_v18, %v758_v23 }
 0x58a   :  { %v789_v29 = vadd.f32 %v1856_v12, %v788_v25 }
 0x58b   :  { %v763_v35 = vsel %vm762_vm6, %v1854_v18, %v759_v27 }
 0x58c   :  { %v793_v36 = vsel %vm792_vm8, %v1856_v12, %v789_v29  ;;  %v768_v58 = vsel %vm765_vm9, %v767_v39, %v763_v35 }
 0x58d   :  { %v798_v43 = vsel %vm795_vm10, %v797_v41, %v793_v36 }
 0x5cb   :  { %v829_v40 = vpop.permute.xlu1 %828 }
 0x5cc   :  { %v834_v38 = vmul.f32 %v829_v40, %v768_v58 }
 0x5d3   :  { %v831_v44 = vpop.permute.xlu2 %830 }
 0x5d4   :  { %v835_v42 = vmul.f32 %v831_v44, %v798_v43 }
 0x5d6   :  { %v843_v45 = vpack.c.bf16 %v835_v42, %v834_v38 }
 0x5d8   :  { %1736 = vmatmul.msk.bf16.vlgmr.msrb.gmra.mxu2 %vm378_vm4, %v843_v45  ;;  %1737 = vmatmul.msk.bf16.vlgmr.msrb.gmra.mxu3 %vm378_vm4, %v843_v45 }
 0x5d9   :  { %1175 = vmatpush.bf16.msrb.mxu3 %v2125_v4  ;;  %1161 = vmatpush.bf16.msrb.mxu2 %v2136_v26 }
 0x5dd   :  { %1176 = vmatpush.bf16.msrb.mxu3 %v2128_v9  ;;  %1162 = vmatpush.bf16.msrb.mxu2 %v2139_v31 }
 0x5e1   :  { %1177 = vmatpush.bf16.msrb.mxu3 %v2131_v14  ;;  %1163 = vmatpush.bf16.msrb.mxu2 %v2143_v37 }
 0x5e5   :  { %1178 = vmatpush.bf16.msrb.mxu3 %v2134_v24  ;;  %1164 = vmatpush.bf16.msrb.mxu2 %v2147_v46 }
 0x65b   :  { %v870_v48 = vpop.f32.mrf.mxu3  ;;  %v856_v60 = vpop.f32.mrf.mxu2 }
 0x65c   :  { %v2289_v50 = vadd.f32 %v870_v48, %v261_v47  ;;  %v875_v61 = vadd.f32 %v856_v60, %v196_v59  ;;  %v72_v59 = vld [vmem:[#allocation3 + $0x48] sm:$0xff] }
 0x65d   :  { %vm90_vm5 = vcmp.eq.s32.totalorder %v72_v59, %v2150_v49 }
 0x65e   :  { %1857 = vtanh.f32 %v2289_v50  ;;  %v1738_v62 = vmul.f32 -1.442695, %v875_v61 }
 0x663   :  { %v872_v52 = vpop.f32.mrf.mxu3  ;;  %v858_v1 = vpop.f32.mrf.mxu2 }
 0x664   :  { %v1858_v54 = vpop.eup %1857  ;;  %v2292_v55 = vadd.f32 %v872_v52, %v264_v51  ;;  %v877_v2 = vadd.f32 %v858_v1, %v199_v63 }
 0x665   :  { %961 = vrot.lane.b32.xlu0 %v1858_v54, %s2088_s2 }
 0x666   :  { %1859 = vtanh.f32 %v2292_v55  ;;  %v1740_v6 = vmul.f32 -1.442695, %v877_v2  ;;  %v1741_v47 = vmul.f32 -1.442695, %v2292_v55 }
 0x667   :  { %1861 = vpow2.f32 %v1738_v62 }
 0x668   :  { %1863 = vpow2.f32 %v1740_v6 }
 0x66c   :  { %v1860_v56 = vpop.eup %1859 }
 0x66d   :  { %963 = vrot.lane.b32.xlu1 %v1860_v56, %s2088_s2  ;;  %v1862_v7 = vpop.eup %1861 }
 0x66e   :  { %v891_v0 = vadd.f32 1.0, %v1862_v7  ;;  %v1864_v8 = vpop.eup %1863 }
 0x66f   :  { %v893_v28 = vadd.f32 1.0, %v1864_v8 }
 0x670   :  { %1865 = vrcp.f32 %v891_v0  ;;  %v906_v12 = vand.u32 2147483648, %v891_v0  ;;  %vm900_vm12 = vweird.f32 %v891_v0  ;;  %v904_v17 = vand.u32 2147483647, %v891_v0 }
 0x671   :  { %1867 = vrcp.f32 %v893_v28  ;;  %v936_v30 = vand.u32 2147483648, %v893_v28  ;;  %vm930_vm0 = vweird.f32 %v893_v28  ;;  %v934_v32 = vand.u32 2147483647, %v893_v28 }
 0x672   :  { %v907_v22 = vor.u32 1.1754944e-38, %v906_v12  ;;  %vm905_vm14 = vcmp.eq.f32.partialorder %v904_v17, 8.507059e+37 }
 0x673   :  { %v937_v53 = vor.u32 1.1754944e-38, %v936_v30  ;;  %vm935_vm2 = vcmp.eq.f32.partialorder %v934_v32, 8.507059e+37 }
 0x676   :  { %v1866_v10 = vpop.eup %1865 }
 0x677   :  { %v896_v11 = vmul.f32 %v1866_v10, %v891_v0  ;;  %v1868_v15 = vpop.eup %1867  ;;  %vm901_vm11 = vweird.f32 %v1866_v10 }
 0x678   :  { %v926_v33 = vmul.f32 %v1868_v15, %v893_v28  ;;  %vm902_vm13 = vmor %vm900_vm12, %vm901_vm11  ;;  %vm931_vm15 = vweird.f32 %v1868_v15 }
 0x679   :  { %v897_v13 = vsub.f32 1.0, %v896_v11  ;;  %vm932_vm1 = vmor %vm930_vm0, %vm931_vm15 }
 0x67a   :  { %v927_v19 = vsub.f32 1.0, %v926_v33 }
 0x67b   :  { %v898_v16 = vmul.f32 %v1866_v10, %v897_v13 }
 0x67c   :  { %v928_v21 = vmul.f32 %v1868_v15, %v927_v19 }
 0x67d   :  { %v899_v18 = vadd.f32 %v1866_v10, %v898_v16 }
 0x67e   :  { %v929_v29 = vadd.f32 %v1868_v15, %v928_v21 }
 0x67f   :  { %v903_v20 = vsel %vm902_vm13, %v1866_v10, %v899_v18 }
 0x680   :  { %v908_v25 = vsel %vm905_vm14, %v907_v22, %v903_v20  ;;  %v933_v34 = vsel %vm932_vm1, %v1868_v15, %v929_v29 }
 0x681   :  { %v938_v36 = vsel %vm935_vm2, %v937_v53, %v933_v34  ;;  %v957_v40 = vmul.f32 %v908_v25, %v2262_v3  ;;  %v1739_v3 = vmul.f32 -1.442695, %v2289_v50 }
 0x682   :  { %v958_v44 = vmul.f32 %v938_v36, %v2267_v5  ;;  %v71_v5 = vld [vmem:[#allocation3 + $0x40] sm:$0xff] }
 0x683   :  { %vm89_vm3 = vcmp.eq.s32.totalorder %v71_v5, %v2150_v49 }
 0x684   :  { %1664 = vmatmul.msk.f32.gmra.mxu0 %vm89_vm3, %v2087_v57  ;;  %1680 = vmatmul.msk.f32.gmra.mxu1 %vm89_vm3, %v2087_v57 }
 0x68c   :  { %1665 = vmatmul.msk.f32.gmra.mxu0 %vm90_vm5, %v2087_v57  ;;  %1681 = vmatmul.msk.f32.gmra.mxu1 %vm90_vm5, %v2087_v57 }
 0x6d7   :  { %v962_v23 = vpop.permute.xlu0 %961 }
 0x6d8   :  { %v967_v27 = vmul.f32 %v962_v23, %v908_v25 }
 0x6da   :  { %971 = vrot.lane.b32.xlu2 %v967_v27, %s2088_s2 }
 0x6df   :  { %v964_v35 = vpop.permute.xlu1 %963 }
 0x6e0   :  { %v968_v39 = vmul.f32 %v964_v35, %v938_v36 }
 0x6e2   :  { %973 = vrot.lane.b32.xlu0 %v968_v39, %s2088_s2 }
 0x701   :  { %v267_v21 = vpop.f32.mrf.mxu1  ;;  %v202_v34 = vpop.f32.mrf.mxu0 }
 0x709   :  { %v270_v25 = vpop.f32.mrf.mxu1  ;;  %v205_v39 = vpop.f32.mrf.mxu0 }
 0x734   :  { %v972_v41 = vpop.permute.xlu2 %971 }
 0x735   :  { %v2300_v58 = vadd.f32 %v972_v41, %v957_v40 }
 0x737   :  { %1869 = vtanh.f32 %v2300_v58 }
 0x73d   :  { %v1870_v43 = vpop.eup %1869 }
 0x73e   :  { %983 = vrot.lane.b32.xlu1 %v1870_v43, %s2088_s2 }
 0x754   :  { %v974_v38 = vpop.permute.xlu0 %973 }
 0x755   :  { %v2305_v42 = vadd.f32 %v974_v38, %v958_v44 }
 0x757   :  { %1871 = vtanh.f32 %v2305_v42 }
 0x758   :  { %1873 = vpow2.f32 %v1739_v3 }
 0x759   :  { %1875 = vpow2.f32 %v1741_v47 }
 0x75d   :  { %v1872_v45 = vpop.eup %1871 }
 0x75e   :  { %985 = vrot.lane.b32.xlu2 %v1872_v45, %s2088_s2  ;;  %v1874_v48 = vpop.eup %1873 }
 0x75f   :  { %v1876_v51 = vpop.eup %1875  ;;  %v892_v52 = vadd.f32 1.0, %v1874_v48 }
 0x760   :  { %v894_v54 = vadd.f32 1.0, %v1876_v51 }
 0x761   :  { %1877 = vrcp.f32 %v892_v52  ;;  %vm915_vm8 = vweird.f32 %v892_v52  ;;  %v921_v7 = vand.u32 2147483648, %v892_v52  ;;  %v919_v8 = vand.u32 2147483647, %v892_v52 }
 0x762   :  { %1879 = vrcp.f32 %v894_v54  ;;  %v951_v0 = vand.u32 2147483648, %v894_v54  ;;  %vm945_vm10 = vweird.f32 %v894_v54  ;;  %v949_v28 = vand.u32 2147483647, %v894_v54 }
 0x763   :  { %v922_v13 = vor.u32 1.1754944e-38, %v921_v7  ;;  %vm920_vm12 = vcmp.eq.f32.partialorder %v919_v8, 8.507059e+37 }
 0x764   :  { %v952_v16 = vor.u32 1.1754944e-38, %v951_v0  ;;  %vm950_vm13 = vcmp.eq.f32.partialorder %v949_v28, 8.507059e+37 }
 0x767   :  { %v1878_v56 = vpop.eup %1877 }
 0x768   :  { %v1880_v50 = vpop.eup %1879  ;;  %v911_v55 = vmul.f32 %v1878_v56, %v892_v52  ;;  %vm916_vm6 = vweird.f32 %v1878_v56 }
 0x769   :  { %v941_v60 = vmul.f32 %v1880_v50, %v894_v54  ;;  %vm946_vm7 = vweird.f32 %v1880_v50  ;;  %vm917_vm9 = vmor %vm915_vm8, %vm916_vm6 }
 0x76a   :  { %v912_v61 = vsub.f32 1.0, %v911_v55  ;;  %vm947_vm11 = vmor %vm945_vm10, %vm946_vm7 }
 0x76b   :  { %v942_v62 = vsub.f32 1.0, %v941_v60 }
 0x76c   :  { %v913_v63 = vmul.f32 %v1878_v56, %v912_v61 }
 0x76d   :  { %v943_v1 = vmul.f32 %v1880_v50, %v942_v62 }
 0x76e   :  { %v914_v2 = vadd.f32 %v1878_v56, %v913_v63 }
 0x76f   :  { %v944_v6 = vadd.f32 %v1880_v50, %v943_v1 }
 0x770   :  { %v918_v10 = vsel %vm917_vm9, %v1878_v56, %v914_v2 }
 0x771   :  { %v948_v11 = vsel %vm947_vm11, %v1880_v50, %v944_v6  ;;  %v923_v33 = vsel %vm920_vm12, %v922_v13, %v918_v10 }
 0x772   :  { %v953_v18 = vsel %vm950_vm13, %v952_v16, %v948_v11 }
 0x7b0   :  { %v984_v15 = vpop.permute.xlu1 %983 }
 0x7b1   :  { %v989_v12 = vmul.f32 %v984_v15, %v923_v33 }
 0x7b8   :  { %v986_v19 = vpop.permute.xlu2 %985 }
 0x7b9   :  { %v990_v17 = vmul.f32 %v986_v19, %v953_v18 }
 0x7bb   :  { %v998_v20 = vpack.c.bf16 %v990_v17, %v989_v12 }
 0x7bd   :  { %1742 = vmatmul.msk.bf16.vlgmr.msra.gmra.mxu2 %vm378_vm4, %v998_v20  ;;  %1743 = vmatmul.msk.bf16.vlgmr.msra.gmra.mxu3 %vm378_vm4, %v998_v20 }
 0x7be   :  { %1330 = vmatpush.bf16.msra.mxu3 %v2125_v4  ;;  %1316 = vmatpush.bf16.msra.mxu2 %v2136_v26 }
 0x7c2   :  { %1331 = vmatpush.bf16.msra.mxu3 %v2128_v9  ;;  %1317 = vmatpush.bf16.msra.mxu2 %v2139_v31 }
 0x7c6   :  { %1332 = vmatpush.bf16.msra.mxu3 %v2131_v14  ;;  %1318 = vmatpush.bf16.msra.mxu2 %v2143_v37 }
 0x7ca   :  { %1333 = vmatpush.bf16.msra.mxu3 %v2134_v24  ;;  %1319 = vmatpush.bf16.msra.mxu2 %v2147_v46 }
 0x840   :  { %v1025_v22 = vpop.f32.mrf.mxu3  ;;  %v1011_v53 = vpop.f32.mrf.mxu2 }
 0x841   :  { %v2327_v23 = vadd.f32 %v1025_v22, %v267_v21  ;;  %v1030_v35 = vadd.f32 %v1011_v53, %v202_v34  ;;  %v74_v34 = vld [vmem:[#allocation3 + $0x58] sm:$0xff] }
 0x842   :  { %vm92_vm8 = vcmp.eq.s32.totalorder %v74_v34, %v2150_v49 }
 0x843   :  { %1881 = vtanh.f32 %v2327_v23  ;;  %v1744_v36 = vmul.f32 -1.442695, %v1030_v35 }
 0x848   :  { %v1027_v27 = vpop.f32.mrf.mxu3  ;;  %v1013_v40 = vpop.f32.mrf.mxu2 }
 0x849   :  { %v1882_v29 = vpop.eup %1881  ;;  %v2330_v30 = vadd.f32 %v1027_v27, %v270_v25  ;;  %v1032_v41 = vadd.f32 %v1013_v40, %v205_v39 }
 0x84a   :  { %1116 = vrot.lane.b32.xlu0 %v1882_v29, %s2088_s2 }
 0x84b   :  { %1883 = vtanh.f32 %v2330_v30  ;;  %v1746_v43 = vmul.f32 -1.442695, %v1032_v41  ;;  %v1747_v21 = vmul.f32 -1.442695, %v2330_v30 }
 0x84c   :  { %1885 = vpow2.f32 %v1744_v36 }
 0x84d   :  { %1887 = vpow2.f32 %v1746_v43 }
 0x851   :  { %v1884_v32 = vpop.eup %1883 }
 0x852   :  { %1118 = vrot.lane.b32.xlu1 %v1884_v32, %s2088_s2  ;;  %v1886_v44 = vpop.eup %1885 }
 0x853   :  { %v1046_v38 = vadd.f32 1.0, %v1886_v44  ;;  %v1888_v45 = vpop.eup %1887 }
 0x854   :  { %v1048_v3 = vadd.f32 1.0, %v1888_v45 }
 0x855   :  { %1889 = vrcp.f32 %v1046_v38  ;;  %v1061_v50 = vand.u32 2147483648, %v1046_v38  ;;  %vm1055_vm15 = vweird.f32 %v1046_v38  ;;  %v1059_v55 = vand.u32 2147483647, %v1046_v38 }
 0x856   :  { %1891 = vrcp.f32 %v1048_v3  ;;  %v1091_v7 = vand.u32 2147483648, %v1048_v3  ;;  %vm1085_vm3 = vweird.f32 %v1048_v3  ;;  %v1089_v0 = vand.u32 2147483647, %v1048_v3 }
 0x857   :  { %v1062_v62 = vor.u32 1.1754944e-38, %v1061_v50  ;;  %vm1060_vm1 = vcmp.eq.f32.partialorder %v1059_v55, 8.507059e+37 }
 0x858   :  { %v1092_v28 = vor.u32 1.1754944e-38, %v1091_v7  ;;  %vm1090_vm6 = vcmp.eq.f32.partialorder %v1089_v0, 8.507059e+37 }
 0x85b   :  { %v1890_v47 = vpop.eup %1889 }
 0x85c   :  { %v1051_v48 = vmul.f32 %v1890_v47, %v1046_v38  ;;  %v1892_v52 = vpop.eup %1891  ;;  %vm1056_vm14 = vweird.f32 %v1890_v47 }
 0x85d   :  { %v1081_v5 = vmul.f32 %v1892_v52, %v1048_v3  ;;  %vm1057_vm0 = vmor %vm1055_vm15, %vm1056_vm14  ;;  %vm1086_vm2 = vweird.f32 %v1892_v52 }
 0x85e   :  { %v1052_v51 = vsub.f32 1.0, %v1051_v48  ;;  %vm1087_vm5 = vmor %vm1085_vm3, %vm1086_vm2 }
 0x85f   :  { %v1082_v59 = vsub.f32 1.0, %v1081_v5 }
 0x860   :  { %v1053_v54 = vmul.f32 %v1890_v47, %v1052_v51 }
 0x861   :  { %v1083_v61 = vmul.f32 %v1892_v52, %v1082_v59 }
 0x862   :  { %v1054_v56 = vadd.f32 %v1890_v47, %v1053_v54 }
 0x863   :  { %v1084_v6 = vadd.f32 %v1892_v52, %v1083_v61 }
 0x864   :  { %v1058_v60 = vsel %vm1057_vm0, %v1890_v47, %v1054_v56 }
 0x865   :  { %v1063_v1 = vsel %vm1060_vm1, %v1062_v62, %v1058_v60  ;;  %v1088_v8 = vsel %vm1087_vm5, %v1892_v52, %v1084_v6 }
 0x866   :  { %v1093_v11 = vsel %vm1090_vm6, %v1092_v28, %v1088_v8  ;;  %v1112_v15 = vmul.f32 %v1063_v1, %v2300_v58  ;;  %v1745_v58 = vmul.f32 -1.442695, %v2327_v23 }
 0x867   :  { %v1113_v19 = vmul.f32 %v1093_v11, %v2305_v42  ;;  %v73_v42 = vld [vmem:[#allocation3 + $0x50] sm:$0xff] }
 0x868   :  { %vm91_vm7 = vcmp.eq.s32.totalorder %v73_v42, %v2150_v49 }
 0x869   :  { %1666 = vmatmul.msk.f32.gmra.mxu0 %vm91_vm7, %v2087_v57  ;;  %1682 = vmatmul.msk.f32.gmra.mxu1 %vm91_vm7, %v2087_v57 }
 0x871   :  { %1667 = vmatmul.msk.f32.gmra.mxu0 %vm92_vm8, %v2087_v57  ;;  %1683 = vmatmul.msk.f32.gmra.mxu1 %vm92_vm8, %v2087_v57 }
 0x8bc   :  { %v1117_v63 = vpop.permute.xlu0 %1116 }
 0x8bd   :  { %v1122_v2 = vmul.f32 %v1117_v63, %v1063_v1 }
 0x8bf   :  { %1126 = vrot.lane.b32.xlu2 %v1122_v2, %s2088_s2 }
 0x8c4   :  { %v1119_v10 = vpop.permute.xlu1 %1118 }
 0x8c5   :  { %v1123_v13 = vmul.f32 %v1119_v10, %v1093_v11 }
 0x8c7   :  { %1128 = vrot.lane.b32.xlu0 %v1123_v13, %s2088_s2 }
 0x8e6   :  { %v273_v61 = vpop.f32.mrf.mxu1 }
 0x919   :  { %v1127_v16 = vpop.permute.xlu2 %1126 }
 0x91a   :  { %v2338_v33 = vadd.f32 %v1127_v16, %v1112_v15 }
 0x91c   :  { %1893 = vtanh.f32 %v2338_v33 }
 0x922   :  { %v1894_v18 = vpop.eup %1893 }
 0x923   :  { %1138 = vrot.lane.b32.xlu1 %v1894_v18, %s2088_s2 }
 0x939   :  { %v1129_v12 = vpop.permute.xlu0 %1128 }
 0x93a   :  { %v2343_v17 = vadd.f32 %v1129_v12, %v1113_v19 }
 0x93c   :  { %1895 = vtanh.f32 %v2343_v17 }
 0x93d   :  { %1897 = vpow2.f32 %v1745_v58 }
 0x93e   :  { %1899 = vpow2.f32 %v1747_v21 }
 0x942   :  { %v1896_v20 = vpop.eup %1895 }
 0x943   :  { %1140 = vrot.lane.b32.xlu2 %v1896_v20, %s2088_s2  ;;  %v1898_v22 = vpop.eup %1897 }
 0x944   :  { %v1900_v25 = vpop.eup %1899  ;;  %v1047_v27 = vadd.f32 1.0, %v1898_v22 }
 0x945   :  { %v1049_v29 = vadd.f32 1.0, %v1900_v25 }
 0x946   :  { %1901 = vrcp.f32 %v1047_v27  ;;  %vm1070_vm11 = vweird.f32 %v1047_v27  ;;  %v1076_v44 = vand.u32 2147483648, %v1047_v27  ;;  %v1074_v45 = vand.u32 2147483647, %v1047_v27 }
 0x947   :  { %1903 = vrcp.f32 %v1049_v29  ;;  %v1106_v38 = vand.u32 2147483648, %v1049_v29  ;;  %vm1100_vm13 = vweird.f32 %v1049_v29  ;;  %v1104_v3 = vand.u32 2147483647, %v1049_v29 }
 0x948   :  { %v1077_v51 = vor.u32 1.1754944e-38, %v1076_v44  ;;  %vm1075_vm15 = vcmp.eq.f32.partialorder %v1074_v45, 8.507059e+37 }
 0x949   :  { %v1107_v54 = vor.u32 1.1754944e-38, %v1106_v38  ;;  %vm1105_vm0 = vcmp.eq.f32.partialorder %v1104_v3, 8.507059e+37 }
 0x94c   :  { %v1902_v32 = vpop.eup %1901 }
 0x94d   :  { %v1904_v23 = vpop.eup %1903  ;;  %v1066_v30 = vmul.f32 %v1902_v32, %v1047_v27  ;;  %vm1071_vm9 = vweird.f32 %v1902_v32 }
 0x94e   :  { %v1096_v53 = vmul.f32 %v1904_v23, %v1049_v29  ;;  %vm1101_vm10 = vweird.f32 %v1904_v23  ;;  %vm1072_vm12 = vmor %vm1070_vm11, %vm1071_vm9 }
 0x94f   :  { %v1067_v35 = vsub.f32 1.0, %v1066_v30  ;;  %vm1102_vm14 = vmor %vm1100_vm13, %vm1101_vm10 }
 0x950   :  { %v1097_v36 = vsub.f32 1.0, %v1096_v53 }
 0x951   :  { %v1068_v39 = vmul.f32 %v1902_v32, %v1067_v35 }
 0x952   :  { %v1098_v40 = vmul.f32 %v1904_v23, %v1097_v36 }
 0x953   :  { %v1069_v41 = vadd.f32 %v1902_v32, %v1068_v39 }
 0x954   :  { %v1099_v43 = vadd.f32 %v1904_v23, %v1098_v40 }
 0x955   :  { %v1073_v47 = vsel %vm1072_vm12, %v1902_v32, %v1069_v41 }
 0x956   :  { %v1103_v48 = vsel %vm1102_vm14, %v1904_v23, %v1099_v43  ;;  %v1078_v5 = vsel %vm1075_vm15, %v1077_v51, %v1073_v47 }
 0x957   :  { %v1108_v56 = vsel %vm1105_vm0, %v1107_v54, %v1103_v48 }
 0x995   :  { %v1139_v52 = vpop.permute.xlu1 %1138 }
 0x996   :  { %v1144_v50 = vmul.f32 %v1139_v52, %v1078_v5 }
 0x99d   :  { %v1141_v59 = vpop.permute.xlu2 %1140 }
 0x99e   :  { %v1145_v55 = vmul.f32 %v1141_v59, %v1108_v56 }
 0x9a0   :  { %v1153_v60 = vpack.c.bf16 %v1145_v55, %v1144_v50  ;;  %v76_v55 = vld [vmem:[#allocation3 + $0x68] sm:$0xff] }
 0x9a1   :  { %vm94_vm11 = vcmp.eq.s32.totalorder %v76_v55, %v2150_v49 }
 0x9a2   :  { %1748 = vmatmul.msk.bf16.vlgmr.msrb.gmra.mxu2 %vm378_vm4, %v1153_v60  ;;  %1749 = vmatmul.msk.bf16.vlgmr.msrb.gmra.mxu3 %vm378_vm4, %v1153_v60 }
 0x9a3   :  { %1485 = vmatpush.bf16.msrb.mxu3 %v2125_v4  ;;  %1471 = vmatpush.bf16.msrb.mxu2 %v2136_v26  ;;  %v276_v4 = vpop.f32.mrf.mxu1 }
 0x9a7   :  { %1486 = vmatpush.bf16.msrb.mxu3 %v2128_v9  ;;  %1472 = vmatpush.bf16.msrb.mxu2 %v2139_v31 }
 0x9ab   :  { %1487 = vmatpush.bf16.msrb.mxu3 %v2131_v14  ;;  %1473 = vmatpush.bf16.msrb.mxu2 %v2143_v37 }
 0x9af   :  { %1488 = vmatpush.bf16.msrb.mxu3 %v2134_v24  ;;  %1474 = vmatpush.bf16.msrb.mxu2 %v2147_v46  ;;  %v208_v24 = vpop.f32.mrf.mxu0 }
 0x9b7   :  { %v211_v2 = vpop.f32.mrf.mxu0 }
 0xa25   :  { %v1180_v62 = vpop.f32.mrf.mxu3  ;;  %v1166_v31 = vpop.f32.mrf.mxu2 }
 0xa26   :  { %v2365_v63 = vadd.f32 %v1180_v62, %v273_v61  ;;  %v1185_v37 = vadd.f32 %v1166_v31, %v208_v24 }
 0xa28   :  { %1905 = vtanh.f32 %v2365_v63  ;;  %v1750_v46 = vmul.f32 -1.442695, %v1185_v37 }
 0xa2d   :  { %v1182_v26 = vpop.f32.mrf.mxu3  ;;  %v1168_v6 = vpop.f32.mrf.mxu2 }
 0xa2e   :  { %v1906_v1 = vpop.eup %1905  ;;  %v2368_v9 = vadd.f32 %v1182_v26, %v276_v4  ;;  %v1187_v7 = vadd.f32 %v1168_v6, %v211_v2 }
 0xa2f   :  { %1271 = vrot.lane.b32.xlu0 %v1906_v1, %s2088_s2 }
 0xa30   :  { %1907 = vtanh.f32 %v2368_v9  ;;  %v1752_v0 = vmul.f32 -1.442695, %v1187_v7  ;;  %v1753_v52 = vmul.f32 -1.442695, %v2368_v9 }
 0xa31   :  { %1909 = vpow2.f32 %v1750_v46 }
 0xa32   :  { %1911 = vpow2.f32 %v1752_v0 }
 0xa36   :  { %v1908_v14 = vpop.eup %1907 }
 0xa37   :  { %1273 = vrot.lane.b32.xlu1 %v1908_v14, %s2088_s2  ;;  %v1910_v8 = vpop.eup %1909 }
 0xa38   :  { %v1201_v28 = vadd.f32 1.0, %v1910_v8  ;;  %v1912_v10 = vpop.eup %1911 }
 0xa39   :  { %v1203_v11 = vadd.f32 1.0, %v1912_v10 }
 0xa3a   :  { %1913 = vrcp.f32 %v1201_v28  ;;  %v1216_v21 = vand.u32 2147483648, %v1201_v28  ;;  %vm1210_vm2 = vweird.f32 %v1201_v28  ;;  %v1214_v22 = vand.u32 2147483647, %v1201_v28 }
 0xa3b   :  { %1915 = vrcp.f32 %v1203_v11  ;;  %v1246_v30 = vand.u32 2147483648, %v1203_v11  ;;  %vm1240_vm7 = vweird.f32 %v1203_v11  ;;  %v1244_v53 = vand.u32 2147483647, %v1203_v11 }
 0xa3c   :  { %v1217_v29 = vor.u32 1.1754944e-38, %v1216_v21  ;;  %vm1215_vm5 = vcmp.eq.f32.partialorder %v1214_v22, 8.507059e+37 }
 0xa3d   :  { %v1247_v36 = vor.u32 1.1754944e-38, %v1246_v30  ;;  %vm1245_vm9 = vcmp.eq.f32.partialorder %v1244_v53, 8.507059e+37 }
 0xa40   :  { %v1914_v13 = vpop.eup %1913 }
 0xa41   :  { %v1206_v15 = vmul.f32 %v1914_v13, %v1201_v28  ;;  %v1916_v18 = vpop.eup %1915  ;;  %vm1211_vm1 = vweird.f32 %v1914_v13 }
 0xa42   :  { %v1236_v12 = vmul.f32 %v1916_v18, %v1203_v11  ;;  %vm1212_vm3 = vmor %vm1210_vm2, %vm1211_vm1  ;;  %vm1241_vm6 = vweird.f32 %v1916_v18 }
 0xa43   :  { %v1207_v16 = vsub.f32 1.0, %v1206_v15  ;;  %vm1242_vm8 = vmor %vm1240_vm7, %vm1241_vm6 }
 0xa44   :  { %v1237_v58 = vsub.f32 1.0, %v1236_v12 }
 0xa45   :  { %v1208_v19 = vmul.f32 %v1914_v13, %v1207_v16 }
 0xa46   :  { %v1238_v27 = vmul.f32 %v1916_v18, %v1237_v58 }
 0xa47   :  { %v1209_v20 = vadd.f32 %v1914_v13, %v1208_v19 }
 0xa48   :  { %v1239_v23 = vadd.f32 %v1916_v18, %v1238_v27 }
 0xa49   :  { %v1213_v25 = vsel %vm1212_vm3, %v1914_v13, %v1209_v20 }
 0xa4a   :  { %v1218_v32 = vsel %vm1215_vm5, %v1217_v29, %v1213_v25  ;;  %v1243_v35 = vsel %vm1242_vm8, %v1916_v18, %v1239_v23 }
 0xa4b   :  { %v1248_v40 = vsel %vm1245_vm9, %v1247_v36, %v1243_v35  ;;  %v1267_v43 = vmul.f32 %v1218_v32, %v2338_v33  ;;  %v1751_v33 = vmul.f32 -1.442695, %v2365_v63 }
 0xa4c   :  { %v1268_v3 = vmul.f32 %v1248_v40, %v2343_v17  ;;  %v75_v17 = vld [vmem:[#allocation3 + $0x60] sm:$0xff] }
 0xa4d   :  { %vm93_vm10 = vcmp.eq.s32.totalorder %v75_v17, %v2150_v49 }
 0xa4e   :  { %1668 = vmatmul.msk.f32.gmra.mxu0 %vm93_vm10, %v2087_v57  ;;  %1684 = vmatmul.msk.f32.gmra.mxu1 %vm93_vm10, %v2087_v57 }
 0xa56   :  { %1669 = vmatmul.msk.f32.gmra.mxu0 %vm94_vm11, %v2087_v57  ;;  %1685 = vmatmul.msk.f32.gmra.mxu1 %vm94_vm11, %v2087_v57 }
 0xaa1   :  { %v1272_v42 = vpop.permute.xlu0 %1271 }
 0xaa2   :  { %v1277_v34 = vmul.f32 %v1272_v42, %v1218_v32 }
 0xaa4   :  { %1281 = vrot.lane.b32.xlu2 %v1277_v34, %s2088_s2 }
 0xaa9   :  { %v1274_v39 = vpop.permute.xlu1 %1273 }
 0xaaa   :  { %v1278_v41 = vmul.f32 %v1274_v39, %v1248_v40 }
 0xaac   :  { %1283 = vrot.lane.b32.xlu0 %v1278_v41, %s2088_s2 }
 0xacb   :  { %v279_v18 = vpop.f32.mrf.mxu1  ;;  %v214_v27 = vpop.f32.mrf.mxu0 }
 0xad3   :  { %v282_v20 = vpop.f32.mrf.mxu1  ;;  %v217_v34 = vpop.f32.mrf.mxu0 }
 0xafe   :  { %v1282_v44 = vpop.permute.xlu2 %1281 }
 0xaff   :  { %v2376_v38 = vadd.f32 %v1282_v44, %v1267_v43 }
 0xb01   :  { %1917 = vtanh.f32 %v2376_v38 }
 0xb07   :  { %v1918_v45 = vpop.eup %1917 }
 0xb08   :  { %1293 = vrot.lane.b32.xlu1 %v1918_v45, %s2088_s2 }
 0xb1e   :  { %v1284_v47 = vpop.permute.xlu0 %1283 }
 0xb1f   :  { %v2381_v48 = vadd.f32 %v1284_v47, %v1268_v3 }
 0xb21   :  { %1919 = vtanh.f32 %v2381_v48 }
 0xb22   :  { %1921 = vpow2.f32 %v1751_v33 }
 0xb23   :  { %1923 = vpow2.f32 %v1753_v52 }
 0xb27   :  { %v1920_v51 = vpop.eup %1919 }
 0xb28   :  { %1295 = vrot.lane.b32.xlu2 %v1920_v51, %s2088_s2  ;;  %v1922_v54 = vpop.eup %1921 }
 0xb29   :  { %v1924_v5 = vpop.eup %1923  ;;  %v1202_v56 = vadd.f32 1.0, %v1922_v54 }
 0xb2a   :  { %v1204_v59 = vadd.f32 1.0, %v1924_v5 }
 0xb2b   :  { %1925 = vrcp.f32 %v1202_v56  ;;  %vm1225_vm14 = vweird.f32 %v1202_v56  ;;  %v1231_v24 = vand.u32 2147483648, %v1202_v56  ;;  %v1229_v37 = vand.u32 2147483647, %v1202_v56 }
 0xb2c   :  { %1927 = vrcp.f32 %v1204_v59  ;;  %v1261_v31 = vand.u32 2147483648, %v1204_v59  ;;  %vm1255_vm0 = vweird.f32 %v1204_v59  ;;  %v1259_v46 = vand.u32 2147483647, %v1204_v59 }
 0xb2d   :  { %v1232_v7 = vor.u32 1.1754944e-38, %v1231_v24  ;;  %vm1230_vm2 = vcmp.eq.f32.partialorder %v1229_v37, 8.507059e+37 }
 0xb2e   :  { %v1262_v8 = vor.u32 1.1754944e-38, %v1261_v31  ;;  %vm1260_vm3 = vcmp.eq.f32.partialorder %v1259_v46, 8.507059e+37 }
 0xb31   :  { %v1926_v50 = vpop.eup %1925 }
 0xb32   :  { %v1928_v60 = vpop.eup %1927  ;;  %v1221_v61 = vmul.f32 %v1926_v50, %v1202_v56  ;;  %vm1226_vm12 = vweird.f32 %v1926_v50 }
 0xb33   :  { %v1251_v62 = vmul.f32 %v1928_v60, %v1204_v59  ;;  %vm1256_vm13 = vweird.f32 %v1928_v60  ;;  %vm1227_vm15 = vmor %vm1225_vm14, %vm1226_vm12 }
 0xb34   :  { %v1222_v63 = vsub.f32 1.0, %v1221_v61  ;;  %vm1257_vm1 = vmor %vm1255_vm0, %vm1256_vm13 }
 0xb35   :  { %v1252_v4 = vsub.f32 1.0, %v1251_v62 }
 0xb36   :  { %v1223_v26 = vmul.f32 %v1926_v50, %v1222_v63 }
 0xb37   :  { %v1253_v1 = vmul.f32 %v1928_v60, %v1252_v4 }
 0xb38   :  { %v1224_v9 = vadd.f32 %v1926_v50, %v1223_v26 }
 0xb39   :  { %v1254_v14 = vadd.f32 %v1928_v60, %v1253_v1 }
 0xb3a   :  { %v1228_v2 = vsel %vm1227_vm15, %v1926_v50, %v1224_v9 }
 0xb3b   :  { %v1258_v6 = vsel %vm1257_vm1, %v1928_v60, %v1254_v14  ;;  %v1233_v28 = vsel %vm1230_vm2, %v1232_v7, %v1228_v2 }
 0xb3c   :  { %v1263_v10 = vsel %vm1260_vm3, %v1262_v8, %v1258_v6 }
 0xb7a   :  { %v1294_v0 = vpop.permute.xlu1 %1293 }
 0xb7b   :  { %v1299_v13 = vmul.f32 %v1294_v0, %v1233_v28 }
 0xb82   :  { %v1296_v11 = vpop.permute.xlu2 %1295 }
 0xb83   :  { %v1300_v15 = vmul.f32 %v1296_v11, %v1263_v10 }
 0xb85   :  { %v1308_v16 = vpack.c.bf16 %v1300_v15, %v1299_v13  ;;  %v78_v15 = vld [vmem:[#allocation3 + $0x78] sm:$0xff] }
 0xb86   :  { %vm96_vm14 = vcmp.eq.s32.totalorder %v78_v15, %v2150_v49 }
 0xb87   :  { %1754 = vmatmul.msk.bf16.vlgmr.msra.gmra.mxu2 %vm378_vm4, %v1308_v16  ;;  %1755 = vmatmul.msk.bf16.vlgmr.msra.gmra.mxu3 %vm378_vm4, %v1308_v16 }
 0xc0a   :  { %v1335_v19 = vpop.f32.mrf.mxu3  ;;  %v1321_v29 = vpop.f32.mrf.mxu2 }
 0xc0b   :  { %v2395_v12 = vadd.f32 %v1335_v19, %v279_v18  ;;  %v1340_v42 = vadd.f32 %v1321_v29, %v214_v27 }
 0xc0d   :  { %1929 = vtanh.f32 %v2395_v12  ;;  %v1756_v32 = vmul.f32 -1.442695, %v1340_v42 }
 0xc12   :  { %v1337_v58 = vpop.f32.mrf.mxu3  ;;  %v1323_v23 = vpop.f32.mrf.mxu2 }
 0xc13   :  { %v1930_v21 = vpop.eup %1929  ;;  %v2398_v22 = vadd.f32 %v1337_v58, %v282_v20  ;;  %v1342_v30 = vadd.f32 %v1323_v23, %v217_v34 }
 0xc14   :  { %1426 = vrot.lane.b32.xlu0 %v1930_v21, %s2088_s2 }
 0xc15   :  { %1931 = vtanh.f32 %v2398_v22  ;;  %v1758_v53 = vmul.f32 -1.442695, %v1342_v30  ;;  %v1759_v0 = vmul.f32 -1.442695, %v2398_v22 }
 0xc16   :  { %1933 = vpow2.f32 %v1756_v32 }
 0xc17   :  { %1935 = vpow2.f32 %v1758_v53 }
 0xc1b   :  { %v1932_v25 = vpop.eup %1931 }
 0xc1c   :  { %1428 = vrot.lane.b32.xlu1 %v1932_v25, %s2088_s2  ;;  %v1934_v35 = vpop.eup %1933 }
 0xc1d   :  { %v1356_v36 = vadd.f32 1.0, %v1934_v35  ;;  %v1936_v39 = vpop.eup %1935 }
 0xc1e   :  { %v1358_v40 = vadd.f32 1.0, %v1936_v39 }
 0xc1f   :  { %1937 = vrcp.f32 %v1356_v36  ;;  %v1371_v52 = vand.u32 2147483648, %v1356_v36  ;;  %vm1365_vm6 = vweird.f32 %v1356_v36  ;;  %v1369_v54 = vand.u32 2147483647, %v1356_v36 }
 0xc20   :  { %1939 = vrcp.f32 %v1358_v40  ;;  %v1401_v61 = vand.u32 2147483648, %v1358_v40  ;;  %vm1395_vm10 = vweird.f32 %v1358_v40  ;;  %v1399_v62 = vand.u32 2147483647, %v1358_v40 }
 0xc21   :  { %v1372_v59 = vor.u32 1.1754944e-38, %v1371_v52  ;;  %vm1370_vm8 = vcmp.eq.f32.partialorder %v1369_v54, 8.507059e+37 }
 0xc22   :  { %v1402_v4 = vor.u32 1.1754944e-38, %v1401_v61  ;;  %vm1400_vm12 = vcmp.eq.f32.partialorder %v1399_v62, 8.507059e+37 }
 0xc25   :  { %v1938_v41 = vpop.eup %1937 }
 0xc26   :  { %v1361_v43 = vmul.f32 %v1938_v41, %v1356_v36  ;;  %v1940_v45 = vpop.eup %1939  ;;  %vm1366_vm5 = vweird.f32 %v1938_v41 }
 0xc27   :  { %v1391_v47 = vmul.f32 %v1940_v45, %v1358_v40  ;;  %vm1367_vm7 = vmor %vm1365_vm6, %vm1366_vm5  ;;  %vm1396_vm9 = vweird.f32 %v1940_v45 }
 0xc28   :  { %v1362_v44 = vsub.f32 1.0, %v1361_v43  ;;  %vm1397_vm11 = vmor %vm1395_vm10, %vm1396_vm9 }
 0xc29   :  { %v1392_v33 = vsub.f32 1.0, %v1391_v47 }
 0xc2a   :  { %v1363_v3 = vmul.f32 %v1938_v41, %v1362_v44 }
 0xc2b   :  { %v1393_v56 = vmul.f32 %v1940_v45, %v1392_v33 }
 0xc2c   :  { %v1364_v51 = vadd.f32 %v1938_v41, %v1363_v3 }
 0xc2d   :  { %v1394_v60 = vadd.f32 %v1940_v45, %v1393_v56 }
 0xc2e   :  { %v1368_v5 = vsel %vm1367_vm7, %v1938_v41, %v1364_v51 }
 0xc2f   :  { %v1373_v50 = vsel %vm1370_vm8, %v1372_v59, %v1368_v5  ;;  %v1398_v63 = vsel %vm1397_vm11, %v1940_v45, %v1394_v60 }
 0xc30   :  { %v1403_v1 = vsel %vm1400_vm12, %v1402_v4, %v1398_v63  ;;  %v1422_v14 = vmul.f32 %v1373_v50, %v2376_v38  ;;  %v1757_v38 = vmul.f32 -1.442695, %v2395_v12 }
 0xc31   :  { %v1423_v46 = vmul.f32 %v1403_v1, %v2381_v48  ;;  %v77_v48 = vld [vmem:[#allocation3 + $0x70] sm:$0xff] }
 0xc32   :  { %vm95_vm13 = vcmp.eq.s32.totalorder %v77_v48, %v2150_v49 }
 0xc33   :  { %1670 = vmatmul.msk.f32.gmra.mxu0 %vm95_vm13, %v2087_v57  ;;  %1686 = vmatmul.msk.f32.gmra.mxu1 %vm95_vm13, %v2087_v57 }
 0xc3b   :  { %1671 = vmatmul.msk.f32.gmra.mxu0 %vm96_vm14, %v2087_v57  ;;  %1687 = vmatmul.msk.f32.gmra.mxu1 %vm96_vm14, %v2087_v57 }
 0xc86   :  { %v1427_v17 = vpop.permute.xlu0 %1426 }
 0xc87   :  { %v1432_v55 = vmul.f32 %v1427_v17, %v1373_v50 }
 0xc89   :  { %1436 = vrot.lane.b32.xlu2 %v1432_v55, %s2088_s2 }
 0xc8e   :  { %v1429_v26 = vpop.permute.xlu1 %1428 }
 0xc8f   :  { %v1433_v9 = vmul.f32 %v1429_v26, %v1403_v1 }
 0xc91   :  { %1438 = vrot.lane.b32.xlu0 %v1433_v9, %s2088_s2 }
 0xcb0   :  { %v285_v43 = vpop.f32.mrf.mxu1  ;;  %v220_v54 = vpop.f32.mrf.mxu0 }
 0xcb8   :  { %v288_v3 = vpop.f32.mrf.mxu1  ;;  %v223_v17 = vpop.f32.mrf.mxu0 }
 0xce3   :  { %v1437_v24 = vpop.permute.xlu2 %1436 }
 0xce4   :  { %v2406_v31 = vadd.f32 %v1437_v24, %v1422_v14 }
 0xce6   :  { %1941 = vtanh.f32 %v2406_v31 }
 0xcec   :  { %v1942_v37 = vpop.eup %1941 }
 0xced   :  { %1448 = vrot.lane.b32.xlu1 %v1942_v37, %s2088_s2 }
 0xd03   :  { %v1439_v2 = vpop.permute.xlu0 %1438 }
 0xd04   :  { %v2411_v6 = vadd.f32 %v1439_v2, %v1423_v46 }
 0xd06   :  { %1943 = vtanh.f32 %v2411_v6 }
 0xd07   :  { %1945 = vpow2.f32 %v1757_v38 }
 0xd08   :  { %1947 = vpow2.f32 %v1759_v0 }
 0xd0c   :  { %v1944_v7 = vpop.eup %1943 }
 0xd0d   :  { %1450 = vrot.lane.b32.xlu2 %v1944_v7, %s2088_s2  ;;  %v1946_v8 = vpop.eup %1945 }
 0xd0e   :  { %v1948_v28 = vpop.eup %1947  ;;  %v1357_v10 = vadd.f32 1.0, %v1946_v8 }
 0xd0f   :  { %v1359_v11 = vadd.f32 1.0, %v1948_v28 }
 0xd10   :  { %1949 = vrcp.f32 %v1357_v10  ;;  %vm1380_vm1 = vweird.f32 %v1357_v10  ;;  %v1386_v27 = vand.u32 2147483648, %v1357_v10  ;;  %v1384_v42 = vand.u32 2147483647, %v1357_v10 }
 0xd11   :  { %1951 = vrcp.f32 %v1359_v11  ;;  %v1416_v29 = vand.u32 2147483648, %v1359_v11  ;;  %vm1410_vm3 = vweird.f32 %v1359_v11  ;;  %v1414_v49 = vand.u32 2147483647, %v1359_v11 }
 0xd12   :  { %v1387_v23 = vor.u32 1.1754944e-38, %v1386_v27  ;;  %vm1385_vm6 = vcmp.eq.f32.partialorder %v1384_v42, 8.507059e+37 }
 0xd13   :  { %v1417_v30 = vor.u32 1.1754944e-38, %v1416_v29  ;;  %vm1415_vm7 = vcmp.eq.f32.partialorder %v1414_v49, 8.507059e+37 }
 0xd16   :  { %v1950_v13 = vpop.eup %1949 }
 0xd17   :  { %v1952_v16 = vpop.eup %1951  ;;  %v1376_v18 = vmul.f32 %v1950_v13, %v1357_v10  ;;  %vm1381_vm15 = vweird.f32 %v1950_v13 }
 0xd18   :  { %v1406_v19 = vmul.f32 %v1952_v16, %v1359_v11  ;;  %vm1411_vm0 = vweird.f32 %v1952_v16  ;;  %vm1382_vm2 = vmor %vm1380_vm1, %vm1381_vm15 }
 0xd19   :  { %v1377_v12 = vsub.f32 1.0, %v1376_v18  ;;  %vm1412_vm5 = vmor %vm1410_vm3, %vm1411_vm0 }
 0xd1a   :  { %v1407_v20 = vsub.f32 1.0, %v1406_v19 }
 0xd1b   :  { %v1378_v58 = vmul.f32 %v1950_v13, %v1377_v12 }
 0xd1c   :  { %v1408_v21 = vmul.f32 %v1952_v16, %v1407_v20 }
 0xd1d   :  { %v1379_v22 = vadd.f32 %v1950_v13, %v1378_v58 }
 0xd1e   :  { %v1409_v25 = vadd.f32 %v1952_v16, %v1408_v21 }
 0xd1f   :  { %v1383_v32 = vsel %vm1382_vm2, %v1950_v13, %v1379_v22 }
 0xd20   :  { %v1413_v34 = vsel %vm1412_vm5, %v1952_v16, %v1409_v25  ;;  %v1388_v53 = vsel %vm1385_vm6, %v1387_v23, %v1383_v32 }
 0xd21   :  { %v1418_v35 = vsel %vm1415_vm7, %v1417_v30, %v1413_v34 }
 0xd5f   :  { %v1449_v57 = vpop.permute.xlu1 %1448 }
 0xd60   :  { %v1454_v39 = vmul.f32 %v1449_v57, %v1388_v53 }
 0xd67   :  { %v1451_v36 = vpop.permute.xlu2 %1450 }
 0xd68   :  { %v1455_v40 = vmul.f32 %v1451_v36, %v1418_v35 }
 0xd6a   :  { %v1463_v41 = vpack.c.bf16 %v1455_v40, %v1454_v39 }
 0xd6c   :  { %1760 = vmatmul.msk.bf16.vlgmr.msrb.gmra.mxu2 %vm378_vm4, %v1463_v41  ;;  %1761 = vmatmul.msk.bf16.vlgmr.msrb.gmra.mxu3 %vm378_vm4, %v1463_v41 }
 0xdef   :  { %v1490_v44 = vpop.f32.mrf.mxu3  ;;  %v1476_v5 = vpop.f32.mrf.mxu2 }
 0xdf0   :  { %v2425_v45 = vadd.f32 %v1490_v44, %v285_v43  ;;  %v1495_v56 = vadd.f32 %v1476_v5, %v220_v54 }
 0xdf2   :  { %1953 = vtanh.f32 %v2425_v45  ;;  %v1762_v59 = vmul.f32 -1.442695, %v1495_v56  ;;  %v1763_v34 = vmul.f32 -1.442695, %v2425_v45 }
 0xdf7   :  { %v1492_v47 = vpop.f32.mrf.mxu3  ;;  %v1478_v50 = vpop.f32.mrf.mxu2 }
 0xdf8   :  { %v1954_v51 = vpop.eup %1953  ;;  %v2428_v33 = vadd.f32 %v1492_v47, %v288_v3  ;;  %v1497_v55 = vadd.f32 %v1478_v50, %v223_v17 }
 0xdf9   :  { %1581 = vrot.lane.b32.xlu0 %v1954_v51, %s2088_s2 }
 0xdfa   :  { %1955 = vtanh.f32 %v2428_v33  ;;  %v1764_v60 = vmul.f32 -1.442695, %v1497_v55  ;;  %v1765_v23 = vmul.f32 -1.442695, %v2428_v33 }
 0xdfb   :  { %1957 = vpow2.f32 %v1762_v59 }
 0xdfc   :  { %1959 = vpow2.f32 %v1764_v60 }
 0xe00   :  { %v1956_v52 = vpop.eup %1955 }
 0xe01   :  { %1583 = vrot.lane.b32.xlu1 %v1956_v52, %s2088_s2  ;;  %v1958_v61 = vpop.eup %1957 }
 0xe02   :  { %v1511_v62 = vadd.f32 1.0, %v1958_v61  ;;  %v1960_v63 = vpop.eup %1959 }
 0xe03   :  { %v1513_v4 = vadd.f32 1.0, %v1960_v63 }
 0xe04   :  { %1961 = vrcp.f32 %v1511_v62  ;;  %v1526_v7 = vand.u32 2147483648, %v1511_v62  ;;  %vm1520_vm9 = vweird.f32 %v1511_v62  ;;  %v1524_v38 = vand.u32 2147483647, %v1511_v62 }
 0xe05   :  { %1963 = vrcp.f32 %v1513_v4  ;;  %v1556_v15 = vand.u32 2147483648, %v1513_v4  ;;  %vm1550_vm13 = vweird.f32 %v1513_v4  ;;  %v1554_v16 = vand.u32 2147483647, %v1513_v4 }
 0xe06   :  { %v1527_v28 = vor.u32 1.1754944e-38, %v1526_v7  ;;  %vm1525_vm11 = vcmp.eq.f32.partialorder %v1524_v38, 8.507059e+37 }
 0xe07   :  { %v1557_v19 = vor.u32 1.1754944e-38, %v1556_v15  ;;  %vm1555_vm15 = vcmp.eq.f32.partialorder %v1554_v16, 8.507059e+37 }
 0xe0a   :  { %v1962_v26 = vpop.eup %1961 }
 0xe0b   :  { %v1516_v1 = vmul.f32 %v1962_v26, %v1511_v62  ;;  %v1964_v14 = vpop.eup %1963  ;;  %vm1521_vm8 = vweird.f32 %v1962_v26 }
 0xe0c   :  { %v1546_v37 = vmul.f32 %v1964_v14, %v1513_v4  ;;  %vm1522_vm10 = vmor %vm1520_vm9, %vm1521_vm8  ;;  %vm1551_vm12 = vweird.f32 %v1964_v14 }
 0xe0d   :  { %v1517_v9 = vsub.f32 1.0, %v1516_v1  ;;  %vm1552_vm14 = vmor %vm1550_vm13, %vm1551_vm12 }
 0xe0e   :  { %v1547_v2 = vsub.f32 1.0, %v1546_v37 }
 0xe0f   :  { %v1518_v24 = vmul.f32 %v1962_v26, %v1517_v9 }
 0xe10   :  { %v1548_v8 = vmul.f32 %v1964_v14, %v1547_v2 }
 0xe11   :  { %v1519_v46 = vadd.f32 %v1962_v26, %v1518_v24 }
 0xe12   :  { %v1549_v13 = vadd.f32 %v1964_v14, %v1548_v8 }
 0xe13   :  { %v1523_v0 = vsel %vm1522_vm10, %v1962_v26, %v1519_v46 }
 0xe14   :  { %v1528_v11 = vsel %vm1525_vm11, %v1527_v28, %v1523_v0  ;;  %v1553_v18 = vsel %vm1552_vm14, %v1964_v14, %v1549_v13 }
 0xe15   :  { %v1558_v20 = vsel %vm1555_vm15, %v1557_v19, %v1553_v18  ;;  %v1577_v21 = vmul.f32 %v1528_v11, %v2406_v31 }
 0xe16   :  { %v1578_v29 = vmul.f32 %v1558_v20, %v2411_v6 }
 0xe6b   :  { %v1582_v10 = vpop.permute.xlu0 %1581 }
 0xe6c   :  { %v1587_v48 = vmul.f32 %v1582_v10, %v1528_v11 }
 0xe6e   :  { %1591 = vrot.lane.b32.xlu2 %v1587_v48, %s2088_s2 }
 0xe73   :  { %v1584_v12 = vpop.permute.xlu1 %1583 }
 0xe74   :  { %v1588_v58 = vmul.f32 %v1584_v12, %v1558_v20 }
 0xe76   :  { %1593 = vrot.lane.b32.xlu0 %v1588_v58, %s2088_s2 }
 0xec8   :  { %v1592_v22 = vpop.permute.xlu2 %1591 }
 0xec9   :  { %v1597_v25 = vadd.f32 %v1592_v22, %v1577_v21 }
 0xecb   :  { %1965 = vtanh.f32 %v1597_v25 }
 0xed1   :  { %v1966_v27 = vpop.eup %1965 }
 0xed2   :  { %1603 = vrot.lane.b32.xlu1 %v1966_v27, %s2088_s2 }
 0xee8   :  { %v1594_v42 = vpop.permute.xlu0 %1593 }
 0xee9   :  { %v1598_v49 = vadd.f32 %v1594_v42, %v1578_v29 }
 0xeeb   :  { %1967 = vtanh.f32 %v1598_v49 }
 0xeec   :  { %1969 = vpow2.f32 %v1763_v34 }
 0xeed   :  { %1971 = vpow2.f32 %v1765_v23 }
 0xef1   :  { %v1968_v32 = vpop.eup %1967 }
 0xef2   :  { %1605 = vrot.lane.b32.xlu2 %v1968_v32, %s2088_s2  ;;  %v1970_v31 = vpop.eup %1969 }
 0xef3   :  { %v1512_v57 = vadd.f32 1.0, %v1970_v31  ;;  %v1972_v30 = vpop.eup %1971 }
 0xef4   :  { %v1514_v53 = vadd.f32 1.0, %v1972_v30 }
 0xef5   :  { %1973 = vrcp.f32 %v1512_v57  ;;  %v1541_v45 = vand.u32 2147483648, %v1512_v57  ;;  %vm1535_vm1 = vweird.f32 %v1512_v57  ;;  %v1539_v3 = vand.u32 2147483647, %v1512_v57 }
 0xef6   :  { %1975 = vrcp.f32 %v1514_v53  ;;  %v1571_v59 = vand.u32 2147483648, %v1514_v53  ;;  %vm1565_vm6 = vweird.f32 %v1514_v53  ;;  %v1569_v17 = vand.u32 2147483647, %v1514_v53 }
 0xef7   :  { %v1542_v33 = vor.u32 1.1754944e-38, %v1541_v45  ;;  %vm1540_vm3 = vcmp.eq.f32.partialorder %v1539_v3, 8.507059e+37 }
 0xef8   :  { %v1572_v55 = vor.u32 1.1754944e-38, %v1571_v59  ;;  %vm1570_vm8 = vcmp.eq.f32.partialorder %v1569_v17, 8.507059e+37 }
 0xefb   :  { %v1974_v35 = vpop.eup %1973 }
 0xefc   :  { %v1531_v6 = vmul.f32 %v1974_v35, %v1512_v57  ;;  %v1976_v39 = vpop.eup %1975  ;;  %vm1536_vm0 = vweird.f32 %v1974_v35 }
 0xefd   :  { %v1561_v41 = vmul.f32 %v1976_v39, %v1514_v53  ;;  %vm1537_vm2 = vmor %vm1535_vm1, %vm1536_vm0  ;;  %vm1566_vm5 = vweird.f32 %v1976_v39 }
 0xefe   :  { %v1532_v36 = vsub.f32 1.0, %v1531_v6  ;;  %vm1567_vm7 = vmor %vm1565_vm6, %vm1566_vm5 }
 0xeff   :  { %v1562_v44 = vsub.f32 1.0, %v1561_v41 }
 0xf00   :  { %v1533_v40 = vmul.f32 %v1974_v35, %v1532_v36 }
 0xf01   :  { %v1563_v51 = vmul.f32 %v1976_v39, %v1562_v44 }
 0xf02   :  { %v1534_v43 = vadd.f32 %v1974_v35, %v1533_v40 }
 0xf03   :  { %v1564_v56 = vadd.f32 %v1976_v39, %v1563_v51 }
 0xf04   :  { %v1538_v47 = vsel %vm1537_vm2, %v1974_v35, %v1534_v43 }
 0xf05   :  { %v1543_v52 = vsel %vm1540_vm3, %v1542_v33, %v1538_v47  ;;  %v1568_v50 = vsel %vm1567_vm7, %v1976_v39, %v1564_v56 }
 0xf06   :  { %v1573_v60 = vsel %vm1570_vm8, %v1572_v55, %v1568_v50 }
 0xf44   :  { %v1604_v54 = vpop.permute.xlu1 %1603 }
 0xf45   :  { %v1609_v5 = vmul.f32 %v1604_v54, %v1543_v52 }
 0xf47   :  { %1611 = vst.msk [vmem:[#allocation9] sm:$0xff] %vm378_vm4, %v1609_v5 }
 0xf4c   :  { %v1606_v61 = vpop.permute.xlu2 %1605 }
 0xf4d   :  { %v1610_v62 = vmul.f32 %v1606_v61, %v1573_v60 }
 0xf4f   :  { %1612 = vst.msk [vmem:[#allocation9 + $0x8] sm:$0xff] %vm378_vm4, %v1610_v62 }
 0xf50   :  { %1625 = dma.vmem_to_hbm [thread:$0]  %s1618_s30, 256, %s1620_s6, [#allocation5], %s2083_s24, %s2083_s24, %s2084_s25  }
 0xf51   :  { %2077 = dma.done.wait [#allocation5], 256  }
 0xf52   :  { %2078 = vsyncadd [#allocation5], 4294967040 }
 0xf53   :  { %1630 = vsyncpa [#allocation4], 1 }
 0xf54   :  { %1631 = vsyncpa [#allocation7], 1 }
 0xf55   :  { %1632 = vsyncpa [#allocation5], 1 }

</bundles_post_ra>
